<compile_context>
chip_gen: v7x
topology: tpu7x:2x2x1
jax: 0.10.0
libtpu: 0.0.40
codegen_flags: <defaults>
</compile_context>

<pallas_src>
import functools
import math

import jax
import jax.numpy as jnp
import numpy as np
from jax.experimental import pallas as pl
from jax.experimental.pallas import tpu as pltpu

LN_EPS = 1e-5


# ---------------------------------------------------------------------------
# shared math helpers (pure jnp: usable both inside the Pallas kernel and in
# the pure-JAX reference)
# ---------------------------------------------------------------------------
def _layer_norm(x, gamma, beta):
    """LayerNorm over the last axis; gamma/beta broadcast as (1, E)."""
    mu = jnp.mean(x, axis=-1, keepdims=True)
    var = jnp.mean(jnp.square(x - mu), axis=-1, keepdims=True)
    return (x - mu) * jax.lax.rsqrt(var + LN_EPS) * gamma + beta


def _sinusoidal_embedding(num_embeddings, embedding_dim, padding_idx=0):
    """Matches SinusoidalPositionalEmbedding.get_embedding (row padding_idx = 0)."""
    half = embedding_dim // 2
    step = math.log(10000.0) / (half - 1)
    freq = jnp.exp(jnp.arange(half, dtype=jnp.float32) * -step)
    ang = jnp.arange(num_embeddings, dtype=jnp.float32)[:, None] * freq[None, :]
    emb = jnp.concatenate([jnp.sin(ang), jnp.cos(ang)], axis=1)
    if embedding_dim % 2 == 1:
        emb = jnp.concatenate(
            [emb, jnp.zeros((num_embeddings, 1), jnp.float32)], axis=1)
    if padding_idx is not None:
        emb = emb.at[padding_idx].set(0.0)
    return emb


def _embed_prologue(x_in, padding_idx=0):
    """embed_scale * x + sinusoidal positional embedding; (S,B,E) -> (B,S,E)."""
    # TODO(synk): the data-dependent position gather (make_positions + index_select)
    # stays in plain JAX; it is a tiny prologue with no clean Pallas win here.
    S, B, E = x_in.shape
    embed_scale = math.sqrt(E)
    table = _sinusoidal_embedding(padding_idx + 1 + S, E, padding_idx)
    xb = jnp.transpose(x_in, (1, 0, 2))                           # (B, S, E)
    tok = xb[:, :, 0]
    positions = jnp.where(
        tok != float(padding_idx),
        jnp.arange(padding_idx + 1, padding_idx + 1 + S, dtype=jnp.int32)[None, :],
        padding_idx)
    pos_emb = table[positions]                                    # (B, S, E)
    return embed_scale * xb + pos_emb


# ---------------------------------------------------------------------------
# Pallas kernel: full encoder stack, one grid step per layer.
#   vecs slab rows: 0 ln0g | 1 ln0b | 2 bq(scaled) | 3 bk | 4 bv | 5 b_out
#                   6 ln1g | 7 ln1b | 8 b2
# ---------------------------------------------------------------------------
def _encoder_stack_kernel(num_heads, batch,
                          x_ref, w_in, w_out, w1, w2, vecs, b1s, fln, o_ref):
    layer = pl.program_id(0)
    n_layers = pl.num_programs(0)
    bf = jnp.bfloat16

    # layer 0: seed the VMEM-resident activation (output block, constant index).
    @pl.when(layer == 0)
    def _():
        o_ref[...] = x_ref[...]

    x = o_ref[...]                                   # (M, E) f32, M = B*S
    M, E = x.shape
    B = batch
    S = M // B
    H = num_heads
    Dh = E // H

    vv = vecs[0]                                     # (9, E) f32 slab
    ln0g, ln0b = vv[0:1, :], vv[1:2, :]
    bq, bk, bv = vv[2:3, :], vv[3:4, :], vv[4:5, :]
    b_out      = vv[5:6, :]
    ln1g, ln1b = vv[6:7, :], vv[7:8, :]
    b2         = vv[8:9, :]
    b1         = b1s[0]                              # (1, 4E) f32

    # ---- pre-LN + multi-head self-attention + residual ----------------------
    xn = _layer_norm(x, ln0g, ln0b)
    qkv = jnp.dot(xn.astype(bf), w_in[0],
                  preferred_element_type=jnp.float32)             # (M, 3E) f32
    q = qkv[:, :E] + bq          # 1/sqrt(Dh) already folded into w_in/bq
    k = qkv[:, E:2 * E] + bk
    v = qkv[:, 2 * E:] + bv

    # Tiny static loops (B=2, H=4): assemble head outputs in-register, no scratch.
    # TODO(synk): for larger B/H switch to lax.fori_loop(unroll=True) to bound
    # live ranges, and batch heads into full-width MXU matmuls.
    rows_out = []
    for b in range(B):
        r = slice(b * S, (b + 1) * S)
        heads = []
        for h in range(H):
            c = slice(h * Dh, (h + 1) * Dh)
            qh = q[r, c].astype(bf)
            kh = k[r, c].astype(bf)
            vh = v[r, c].astype(bf)
            logits = jax.lax.dot_general(                         # q @ k^T, (S, S)
                qh, kh, (((1,), (1,)), ((), ())),
                preferred_element_type=jnp.float32)
            logits = logits - jnp.max(logits, axis=-1, keepdims=True)
            p = jnp.exp(logits)
            denom = jnp.sum(p, axis=-1, keepdims=True)            # (S, 1)
            oh = jnp.dot(p.astype(bf), vh,
                         preferred_element_type=jnp.float32)      # (S, Dh)
            # deferred softmax normalization on the (S,Dh) output via EUP recip
            heads.append(oh * pl.reciprocal(denom, approx=True))
        rows_out.append(jnp.concatenate(heads, axis=-1))          # (S, E)
    attn = jnp.concatenate(rows_out, axis=0)                      # (M, E)

    attn = jnp.dot(attn.astype(bf), w_out[0],
                   preferred_element_type=jnp.float32) + b_out
    x = x + attn                                                  # residual (f32)

    # ---- pre-LN + FFN (ReLU) + residual --------------------------------------
    xn = _layer_norm(x, ln1g, ln1b)
    hid = jnp.dot(xn.astype(bf), w1[0],
                  preferred_element_type=jnp.float32) + b1
    hid = jnp.maximum(hid, 0.0)
    ffn = jnp.dot(hid.astype(bf), w2[0],
                  preferred_element_type=jnp.float32) + b2
    x = x + ffn

    o_ref[...] = x.astype(o_ref.dtype)

    # final encoder LayerNorm fused into the last layer's step
    @pl.when(layer == n_layers - 1)
    def _():
        y = o_ref[...]
        o_ref[...] = _layer_norm(y, fln[0:1, :], fln[1:2, :]).astype(o_ref.dtype)


# ---------------------------------------------------------------------------
# wrapper: one pallas_call for the whole stack
# ---------------------------------------------------------------------------
def transformer_encoder_forward(x_in, prepared, num_heads):
    """x_in: (S, B, E) f32; prepared: output of prepare_params()."""
    w_in_s, w_out_s, w1_s, w2_s, vecs, b1s, fln = prepared
    S, B, E = x_in.shape
    L = w_in_s.shape[0]
    M = B * S

    x2d = _embed_prologue(x_in).reshape(M, E)        # (B*S, E) f32

    kernel = functools.partial(_encoder_stack_kernel, num_heads, B)
    out2d = pl.pallas_call(
        kernel,
        out_shape=jax.ShapeDtypeStruct((M, E), jnp.float32),
        grid_spec=pltpu.PrefetchScalarGridSpec(
            num_scalar_prefetch=0,
            grid=(L,),
            in_specs=[
                pl.BlockSpec((M, E), lambda l: (0, 0)),              # activation in
                pl.BlockSpec((1, E, 3 * E), lambda l: (l, 0, 0)),    # w_in  (bf16)
                pl.BlockSpec((1, E, E), lambda l: (l, 0, 0)),        # w_out (bf16)
                pl.BlockSpec((1, E, 4 * E), lambda l: (l, 0, 0)),    # w1    (bf16)
                pl.BlockSpec((1, 4 * E, E), lambda l: (l, 0, 0)),    # w2    (bf16)
                pl.BlockSpec((1, 9, E), lambda l: (l, 0, 0)),        # packed vectors
                pl.BlockSpec((1, 1, 4 * E), lambda l: (l, 0, 0)),    # b1 slab
                pl.BlockSpec((2, E), lambda l: (0, 0)),              # final LN g/b
            ],
            out_specs=pl.BlockSpec((M, E), lambda l: (0, 0)),        # resident act.
        ),
        compiler_params=pltpu.CompilerParams(
            dimension_semantics=("arbitrary",),      # layers are sequential
            # TODO(synk): re-derive per generation at production shapes
            # (v7x: 64 MiB physical; v5e/v6e: 128 MiB).
            vmem_limit_bytes=32 * 1024 * 1024,
        ),
    )(x2d, w_in_s, w_out_s, w1_s, w2_s, vecs, b1s, fln)

    return jnp.transpose(out2d.reshape(B, S, E), (1, 0, 2))         # (S, B, E)


# ---------------------------------------------------------------------------
# parameter construction + one-time kernel-layout prep
# ---------------------------------------------------------------------------
def _xavier(key, shape):
    fan_in, fan_out = shape
    bound = math.sqrt(6.0 / (fan_in + fan_out))
    return jax.random.uniform(key, shape, jnp.float32, -bound, bound)


def make_params(key, embed_dim, layers):
    E = embed_dim
    keys = iter(jax.random.split(key, layers * 12 + 2))

    def ln_pair():
        g = 1.0 + 0.05 * jax.random.normal(next(keys), (1, E), jnp.float32)
        b = 0.05 * jax.random.normal(next(keys), (1, E), jnp.float32)
        return g, b

    layer_params = []
    for _ in range(layers):
        ln0g, ln0b = ln_pair()
        w_in = _xavier(next(keys), (E, 3 * E))        # = in_proj_weight.T
        b_in = 0.02 * jax.random.normal(next(keys), (1, 3 * E), jnp.float32)
        w_out = _xavier(next(keys), (E, E))           # = out_proj.weight.T
        b_out = 0.02 * jax.random.normal(next(keys), (1, E), jnp.float32)
        ln1g, ln1b = ln_pair()
        w1 = _xavier(next(keys), (E, 4 * E))          # = fc1.weight.T
        b1 = 0.02 * jax.random.normal(next(keys), (1, 4 * E), jnp.float32)
        w2 = _xavier(next(keys), (4 * E, E))          # = fc2.weight.T
        b2 = 0.02 * jax.random.normal(next(keys), (1, E), jnp.float32)
        layer_params.append((ln0g, ln0b, w_in, b_in, w_out, b_out,
                             ln1g, ln1b, w1, b1, w2, b2))
    final_g, final_b = ln_pair()
    return tuple(layer_params), (final_g, final_b)


def prepare_params(params, num_heads):
    """One-time prep: fold q-scale, cast matmul weights to bf16, stack per layer,
    and pack the tiny vectors (LN gamma/beta + biases) into two slabs."""
    layer_params, (final_g, final_b) = params
    E = layer_params[0][0].shape[-1]
    scale = 1.0 / math.sqrt(E // num_heads)

    w_in_l, w_out_l, w1_l, w2_l, vecs_l, b1_l = [], [], [], [], [], []
    for (ln0g, ln0b, w_in, b_in, w_out, b_out,
         ln1g, ln1b, w1, b1, w2, b2) in layer_params:
        w_in_scaled = jnp.concatenate([w_in[:, :E] * scale, w_in[:, E:]], axis=1)
        bq = b_in[:, :E] * scale
        bk = b_in[:, E:2 * E]
        bv = b_in[:, 2 * E:]
        w_in_l.append(w_in_scaled.astype(jnp.bfloat16))
        w_out_l.append(w_out.astype(jnp.bfloat16))
        w1_l.append(w1.astype(jnp.bfloat16))
        w2_l.append(w2.astype(jnp.bfloat16))
        vecs_l.append(jnp.concatenate(
            [ln0g, ln0b, bq, bk, bv, b_out, ln1g, ln1b, b2], axis=0))  # (9, E)
        b1_l.append(b1)                                                 # (1, 4E)

    return (jnp.stack(w_in_l), jnp.stack(w_out_l),
            jnp.stack(w1_l), jnp.stack(w2_l),
            jnp.stack(vecs_l),                                   # (L, 9, E) f32
            jnp.stack(b1_l),                                     # (L, 1, 4E) f32
            jnp.concatenate([final_g, final_b], axis=0))         # (2, E) f32


# ---------------------------------------------------------------------------
# pure-JAX reference (same bf16-operand / f32-accumulate / folded-scale
# convention as the kernel, but exact softmax division and full einsums)
# ---------------------------------------------------------------------------
def ref_forward(x_in, params, num_heads):
    layer_params, (final_g, final_b) = params
    S, B, E = x_in.shape
    H = num_heads
    Dh = E // H
    bf = jnp.bfloat16
    scale = 1.0 / math.sqrt(Dh)

    x = _embed_prologue(x_in)                         # (B, S, E)

    def dot(a, w):
        return jnp.dot(a.astype(bf), w.astype(bf),
                       preferred_element_type=jnp.float32)

    for (ln0g, ln0b, w_in, b_in, w_out, b_out,
         ln1g, ln1b, w1, b1, w2, b2) in layer_params:
        w_in_eff = jnp.concatenate([w_in[:, :E] * scale, w_in[:, E:]], axis=1)
        b_in_eff = jnp.concatenate([b_in[:, :E] * scale, b_in[:, E:]], axis=1)
        residual = x
        xn = _layer_norm(x, ln0g, ln0b)
        qkv = dot(xn, w_in_eff) + b_in_eff            # (B, S, 3E)
        q = qkv[..., :E].reshape(B, S, H, Dh).astype(bf)
        k = qkv[..., E:2 * E].reshape(B, S, H, Dh).astype(bf)
        v = qkv[..., 2 * E:].reshape(B, S, H, Dh).astype(bf)
        logits = jnp.einsum('bshd,bthd->bhst', q, k,
                            preferred_element_type=jnp.float32)
        logits = logits - jnp.max(logits, axis=-1, keepdims=True)
        p = jnp.exp(logits)
        p = p / jnp.sum(p, axis=-1, keepdims=True)
        attn = jnp.einsum('bhst,bthd->bshd', p.astype(bf), v,
                          preferred_element_type=jnp.float32).reshape(B, S, E)
        x = residual + dot(attn, w_out) + b_out
        residual = x
        xn = _layer_norm(x, ln1g, ln1b)
        hid = jnp.maximum(dot(xn, w1) + b1, 0.0)
        x = residual + dot(hid, w2) + b2

    x = _layer_norm(x, final_g, final_b)
    return jnp.transpose(x, (1, 0, 2))                # (S, B, E)


# ---------------------------------------------------------------------------
# test
# ---------------------------------------------------------------------------
if __name__ == "__main__":
    SEQ, BATCH, EMBED, HEADS, LAYERS = 8, 2, 32, 4, 2

    root = jax.random.PRNGKey(0)
    pkey, xkey = jax.random.split(root)
    params = make_params(pkey, EMBED, LAYERS)
    prepared = prepare_params(params, HEADS)          # bf16 cast / pack ONCE
    x_in = jax.random.normal(xkey, (SEQ, BATCH, EMBED), jnp.float32)

    fwd = jax.jit(transformer_encoder_forward, static_argnums=2)
    ref_fn = jax.jit(ref_forward, static_argnums=2)

    out = jax.block_until_ready(fwd(x_in, prepared, HEADS))
    ref = jax.block_until_ready(ref_fn(x_in, params, HEADS))

    # bf16 matmul operands + approx EUP reciprocal in the kernel softmax
    np.testing.assert_allclose(np.asarray(out), np.asarray(ref),
                               atol=2e-3, rtol=2e-3)
    print("KERNEL_OK")
</pallas_src>

<mosaic_0001>
module attributes {stable_mosaic.version = 11 : i64} {
  func.func @_encoder_stack_kernel(%arg0: i32, %arg1: memref<16x32xf32, #tpu.memory_space<vmem>>, %arg2: memref<1x32x96xbf16, #tpu.memory_space<vmem>>, %arg3: memref<1x32x32xbf16, #tpu.memory_space<vmem>>, %arg4: memref<1x32x128xbf16, #tpu.memory_space<vmem>>, %arg5: memref<1x128x32xbf16, #tpu.memory_space<vmem>>, %arg6: memref<1x9x32xf32, #tpu.memory_space<vmem>>, %arg7: memref<1x1x128xf32, #tpu.memory_space<vmem>>, %arg8: memref<2x32xf32, #tpu.memory_space<vmem>>, %arg9: memref<16x32xf32, #tpu.memory_space<vmem>>) attributes {dimension_semantics = [#tpu.dimension_semantics<arbitrary>], iteration_bounds = array<i64: 2>, scalar_prefetch = 0 : i64, scratch_operands = 0 : i64, tpu.core_type = #tpu.core_type<tc>, window_params = [{pipeline_mode = #tpu.pipeline_mode<synchronous>, transform_indices = @transform_0, window_bounds = array<i64: 16, 32>}, {transform_indices = @transform_1, window_bounds = array<i64: 1, 32, 96>}, {transform_indices = @transform_2, window_bounds = array<i64: 1, 32, 32>}, {transform_indices = @transform_3, window_bounds = array<i64: 1, 32, 128>}, {transform_indices = @transform_4, window_bounds = array<i64: 1, 128, 32>}, {transform_indices = @transform_5, window_bounds = array<i64: 1, 9, 32>}, {transform_indices = @transform_6, window_bounds = array<i64: 1, 1, 128>}, {pipeline_mode = #tpu.pipeline_mode<synchronous>, transform_indices = @transform_7, window_bounds = array<i64: 2, 32>}, {pipeline_mode = #tpu.pipeline_mode<synchronous>, transform_indices = @transform_8, window_bounds = array<i64: 16, 32>}]} {
    %c0_i32 = arith.constant 0 : i32
    %0 = arith.cmpi eq, %arg0, %c0_i32 : i32
    %1 = arith.extui %0 : i1 to i32
    %c0_i32_0 = arith.constant 0 : i32
    %2 = arith.cmpi ne, %1, %c0_i32_0 : i32
    scf.if %2 {
      %c0_69 = arith.constant 0 : index
      %c0_70 = arith.constant 0 : index
      %255 = vector.load %arg1[%c0_69, %c0_70] : memref<16x32xf32, #tpu.memory_space<vmem>>, vector<16x32xf32>
      %c0_71 = arith.constant 0 : index
      %c0_72 = arith.constant 0 : index
      %256 = vector.load %arg9[%c0_71, %c0_72] : memref<16x32xf32, #tpu.memory_space<vmem>>, vector<16x32xf32>
      tpu.vector_store %arg9[%c0_71, %c0_72], %255 {strides = array<i32>} : memref<16x32xf32, #tpu.memory_space<vmem>>, vector<16x32xf32>,
    } else {
    }
    %c0 = arith.constant 0 : index
    %c0_1 = arith.constant 0 : index
    %3 = vector.load %arg9[%c0, %c0_1] : memref<16x32xf32, #tpu.memory_space<vmem>>, vector<16x32xf32>
    %c0_2 = arith.constant 0 : index
    %c0_3 = arith.constant 0 : index
    %c0_4 = arith.constant 0 : index
    %4 = vector.load %arg6[%c0_2, %c0_3, %c0_4] : memref<1x9x32xf32, #tpu.memory_space<vmem>>, vector<1x9x32xf32>
    %5 = vector.shape_cast %4 : vector<1x9x32xf32> to vector<9x32xf32>
    %6 = vector.extract_strided_slice %5 {offsets = [0, 0], sizes = [1, 32], strides = [1, 1]} : vector<9x32xf32> to vector<1x32xf32>
    %7 = vector.extract_strided_slice %5 {offsets = [1, 0], sizes = [1, 32], strides = [1, 1]} : vector<9x32xf32> to vector<1x32xf32>
    %8 = vector.extract_strided_slice %5 {offsets = [2, 0], sizes = [1, 32], strides = [1, 1]} : vector<9x32xf32> to vector<1x32xf32>
    %9 = vector.extract_strided_slice %5 {offsets = [3, 0], sizes = [1, 32], strides = [1, 1]} : vector<9x32xf32> to vector<1x32xf32>
    %10 = vector.extract_strided_slice %5 {offsets = [4, 0], sizes = [1, 32], strides = [1, 1]} : vector<9x32xf32> to vector<1x32xf32>
    %11 = vector.extract_strided_slice %5 {offsets = [5, 0], sizes = [1, 32], strides = [1, 1]} : vector<9x32xf32> to vector<1x32xf32>
    %12 = vector.extract_strided_slice %5 {offsets = [6, 0], sizes = [1, 32], strides = [1, 1]} : vector<9x32xf32> to vector<1x32xf32>
    %13 = vector.extract_strided_slice %5 {offsets = [7, 0], sizes = [1, 32], strides = [1, 1]} : vector<9x32xf32> to vector<1x32xf32>
    %14 = vector.extract_strided_slice %5 {offsets = [8, 0], sizes = [1, 32], strides = [1, 1]} : vector<9x32xf32> to vector<1x32xf32>
    %c0_5 = arith.constant 0 : index
    %c0_6 = arith.constant 0 : index
    %c0_7 = arith.constant 0 : index
    %15 = vector.load %arg7[%c0_5, %c0_6, %c0_7] : memref<1x1x128xf32, #tpu.memory_space<vmem>>, vector<1x1x128xf32>
    %16 = vector.shape_cast %15 : vector<1x1x128xf32> to vector<1x128xf32>
    %cst = arith.constant dense<0.000000e+00> : vector<16xf32>
    %17 = vector.multi_reduction <add>, %3, %cst [1] : vector<16x32xf32> to vector<16xf32>
    %18 = vector.shape_cast %17 : vector<16xf32> to vector<16x1xf32>
    %cst_8 = arith.constant 3.200000e+01 : f32
    %19 = vector.broadcast %cst_8 : f32 to vector<16x1xf32>
    %20 = arith.divf %18, %19 : vector<16x1xf32>
    %21 = vector.broadcast %20 : vector<16x1xf32> to vector<16x32xf32>
    %22 = arith.subf %3, %21 : vector<16x32xf32>
    %23 = arith.mulf %22, %22 : vector<16x32xf32>
    %cst_9 = arith.constant dense<0.000000e+00> : vector<16xf32>
    %24 = vector.multi_reduction <add>, %23, %cst_9 [1] : vector<16x32xf32> to vector<16xf32>
    %25 = vector.shape_cast %24 : vector<16xf32> to vector<16x1xf32>
    %cst_10 = arith.constant 3.200000e+01 : f32
    %26 = vector.broadcast %cst_10 : f32 to vector<16x1xf32>
    %27 = arith.divf %25, %26 : vector<16x1xf32>
    %28 = vector.broadcast %20 : vector<16x1xf32> to vector<16x32xf32>
    %29 = arith.subf %3, %28 : vector<16x32xf32>
    %cst_11 = arith.constant 9.99999974E-6 : f32
    %30 = vector.broadcast %cst_11 : f32 to vector<16x1xf32>
    %31 = arith.addf %27, %30 : vector<16x1xf32>
    %32 = math.rsqrt %31 : vector<16x1xf32>
    %33 = vector.broadcast %32 : vector<16x1xf32> to vector<16x32xf32>
    %34 = arith.mulf %29, %33 : vector<16x32xf32>
    %35 = vector.broadcast %6 : vector<1x32xf32> to vector<16x32xf32>
    %36 = arith.mulf %34, %35 : vector<16x32xf32>
    %37 = vector.broadcast %7 : vector<1x32xf32> to vector<16x32xf32>
    %38 = arith.addf %36, %37 : vector<16x32xf32>
    %39 = arith.truncf %38 : vector<16x32xf32> to vector<16x32xbf16>
    %c0_12 = arith.constant 0 : index
    %c0_13 = arith.constant 0 : index
    %c0_14 = arith.constant 0 : index
    %40 = vector.load %arg2[%c0_12, %c0_13, %c0_14] : memref<1x32x96xbf16, #tpu.memory_space<vmem>>, vector<1x32x96xbf16>
    %41 = vector.shape_cast %40 : vector<1x32x96xbf16> to vector<32x96xbf16>
    %cst_15 = arith.constant dense<0.000000e+00> : vector<16x96xf32>
    %42 = tpu.matmul %39, %41, %cst_15 {dimension_numbers = #tpu.dot_dimension_numbers<[1], [0], [0], [1], [0, 0, 1, 1], [], []>} : vector<16x32xbf16>, vector<32x96xbf16>, vector<16x96xf32> -> vector<16x96xf32>
    %43 = vector.extract_strided_slice %42 {offsets = [0, 0], sizes = [16, 32], strides = [1, 1]} : vector<16x96xf32> to vector<16x32xf32>
    %44 = vector.broadcast %8 : vector<1x32xf32> to vector<16x32xf32>
    %45 = arith.addf %43, %44 : vector<16x32xf32>
    %46 = vector.extract_strided_slice %42 {offsets = [0, 32], sizes = [16, 32], strides = [1, 1]} : vector<16x96xf32> to vector<16x32xf32>
    %47 = vector.broadcast %9 : vector<1x32xf32> to vector<16x32xf32>
    %48 = arith.addf %46, %47 : vector<16x32xf32>
    %49 = vector.extract_strided_slice %42 {offsets = [0, 64], sizes = [16, 32], strides = [1, 1]} : vector<16x96xf32> to vector<16x32xf32>
    %50 = vector.broadcast %10 : vector<1x32xf32> to vector<16x32xf32>
    %51 = arith.addf %49, %50 : vector<16x32xf32>
    %52 = vector.extract_strided_slice %45 {offsets = [0, 0], sizes = [8, 8], strides = [1, 1]} : vector<16x32xf32> to vector<8x8xf32>
    %53 = arith.truncf %52 : vector<8x8xf32> to vector<8x8xbf16>
    %54 = vector.extract_strided_slice %48 {offsets = [0, 0], sizes = [8, 8], strides = [1, 1]} : vector<16x32xf32> to vector<8x8xf32>
    %55 = arith.truncf %54 : vector<8x8xf32> to vector<8x8xbf16>
    %56 = vector.extract_strided_slice %51 {offsets = [0, 0], sizes = [8, 8], strides = [1, 1]} : vector<16x32xf32> to vector<8x8xf32>
    %57 = arith.truncf %56 : vector<8x8xf32> to vector<8x8xbf16>
    %cst_16 = arith.constant dense<0.000000e+00> : vector<8x8xf32>
    %58 = tpu.matmul %53, %55, %cst_16 {dimension_numbers = #tpu.dot_dimension_numbers<[1], [1], [0], [0], [0, 0, 1, 0], [], []>} : vector<8x8xbf16>, vector<8x8xbf16>, vector<8x8xf32> -> vector<8x8xf32>
    %cst_17 = arith.constant dense<0xFF800000> : vector<8xf32>
    %59 = vector.multi_reduction <maximumf>, %58, %cst_17 [1] : vector<8x8xf32> to vector<8xf32>
    %60 = vector.shape_cast %59 : vector<8xf32> to vector<8x1xf32>
    %61 = vector.broadcast %60 : vector<8x1xf32> to vector<8x8xf32>
    %62 = arith.subf %58, %61 : vector<8x8xf32>
    %63 = math.exp %62 : vector<8x8xf32>
    %cst_18 = arith.constant dense<0.000000e+00> : vector<8xf32>
    %64 = vector.multi_reduction <add>, %63, %cst_18 [1] : vector<8x8xf32> to vector<8xf32>
    %65 = vector.shape_cast %64 : vector<8xf32> to vector<8x1xf32>
    %66 = arith.truncf %63 : vector<8x8xf32> to vector<8x8xbf16>
    %cst_19 = arith.constant dense<0.000000e+00> : vector<8x8xf32>
    %67 = tpu.matmul %66, %57, %cst_19 {dimension_numbers = #tpu.dot_dimension_numbers<[1], [0], [0], [1], [0, 0, 1, 1], [], []>} : vector<8x8xbf16>, vector<8x8xbf16>, vector<8x8xf32> -> vector<8x8xf32>
    %68 = tpu.reciprocal %65 {approx = true} : vector<8x1xf32> -> vector<8x1xf32>
    %69 = vector.broadcast %68 : vector<8x1xf32> to vector<8x8xf32>
    %70 = arith.mulf %67, %69 : vector<8x8xf32>
    %71 = vector.extract_strided_slice %45 {offsets = [0, 8], sizes = [8, 8], strides = [1, 1]} : vector<16x32xf32> to vector<8x8xf32>
    %72 = arith.truncf %71 : vector<8x8xf32> to vector<8x8xbf16>
    %73 = vector.extract_strided_slice %48 {offsets = [0, 8], sizes = [8, 8], strides = [1, 1]} : vector<16x32xf32> to vector<8x8xf32>
    %74 = arith.truncf %73 : vector<8x8xf32> to vector<8x8xbf16>
    %75 = vector.extract_strided_slice %51 {offsets = [0, 8], sizes = [8, 8], strides = [1, 1]} : vector<16x32xf32> to vector<8x8xf32>
    %76 = arith.truncf %75 : vector<8x8xf32> to vector<8x8xbf16>
    %cst_20 = arith.constant dense<0.000000e+00> : vector<8x8xf32>
    %77 = tpu.matmul %72, %74, %cst_20 {dimension_numbers = #tpu.dot_dimension_numbers<[1], [1], [0], [0], [0, 0, 1, 0], [], []>} : vector<8x8xbf16>, vector<8x8xbf16>, vector<8x8xf32> -> vector<8x8xf32>
    %cst_21 = arith.constant dense<0xFF800000> : vector<8xf32>
    %78 = vector.multi_reduction <maximumf>, %77, %cst_21 [1] : vector<8x8xf32> to vector<8xf32>
    %79 = vector.shape_cast %78 : vector<8xf32> to vector<8x1xf32>
    %80 = vector.broadcast %79 : vector<8x1xf32> to vector<8x8xf32>
    %81 = arith.subf %77, %80 : vector<8x8xf32>
    %82 = math.exp %81 : vector<8x8xf32>
    %cst_22 = arith.constant dense<0.000000e+00> : vector<8xf32>
    %83 = vector.multi_reduction <add>, %82, %cst_22 [1] : vector<8x8xf32> to vector<8xf32>
    %84 = vector.shape_cast %83 : vector<8xf32> to vector<8x1xf32>
    %85 = arith.truncf %82 : vector<8x8xf32> to vector<8x8xbf16>
    %cst_23 = arith.constant dense<0.000000e+00> : vector<8x8xf32>
    %86 = tpu.matmul %85, %76, %cst_23 {dimension_numbers = #tpu.dot_dimension_numbers<[1], [0], [0], [1], [0, 0, 1, 1], [], []>} : vector<8x8xbf16>, vector<8x8xbf16>, vector<8x8xf32> -> vector<8x8xf32>
    %87 = tpu.reciprocal %84 {approx = true} : vector<8x1xf32> -> vector<8x1xf32>
    %88 = vector.broadcast %87 : vector<8x1xf32> to vector<8x8xf32>
    %89 = arith.mulf %86, %88 : vector<8x8xf32>
    %90 = vector.extract_strided_slice %45 {offsets = [0, 16], sizes = [8, 8], strides = [1, 1]} : vector<16x32xf32> to vector<8x8xf32>
    %91 = arith.truncf %90 : vector<8x8xf32> to vector<8x8xbf16>
    %92 = vector.extract_strided_slice %48 {offsets = [0, 16], sizes = [8, 8], strides = [1, 1]} : vector<16x32xf32> to vector<8x8xf32>
    %93 = arith.truncf %92 : vector<8x8xf32> to vector<8x8xbf16>
    %94 = vector.extract_strided_slice %51 {offsets = [0, 16], sizes = [8, 8], strides = [1, 1]} : vector<16x32xf32> to vector<8x8xf32>
    %95 = arith.truncf %94 : vector<8x8xf32> to vector<8x8xbf16>
    %cst_24 = arith.constant dense<0.000000e+00> : vector<8x8xf32>
    %96 = tpu.matmul %91, %93, %cst_24 {dimension_numbers = #tpu.dot_dimension_numbers<[1], [1], [0], [0], [0, 0, 1, 0], [], []>} : vector<8x8xbf16>, vector<8x8xbf16>, vector<8x8xf32> -> vector<8x8xf32>
    %cst_25 = arith.constant dense<0xFF800000> : vector<8xf32>
    %97 = vector.multi_reduction <maximumf>, %96, %cst_25 [1] : vector<8x8xf32> to vector<8xf32>
    %98 = vector.shape_cast %97 : vector<8xf32> to vector<8x1xf32>
    %99 = vector.broadcast %98 : vector<8x1xf32> to vector<8x8xf32>
    %100 = arith.subf %96, %99 : vector<8x8xf32>
    %101 = math.exp %100 : vector<8x8xf32>
    %cst_26 = arith.constant dense<0.000000e+00> : vector<8xf32>
    %102 = vector.multi_reduction <add>, %101, %cst_26 [1] : vector<8x8xf32> to vector<8xf32>
    %103 = vector.shape_cast %102 : vector<8xf32> to vector<8x1xf32>
    %104 = arith.truncf %101 : vector<8x8xf32> to vector<8x8xbf16>
    %cst_27 = arith.constant dense<0.000000e+00> : vector<8x8xf32>
    %105 = tpu.matmul %104, %95, %cst_27 {dimension_numbers = #tpu.dot_dimension_numbers<[1], [0], [0], [1], [0, 0, 1, 1], [], []>} : vector<8x8xbf16>, vector<8x8xbf16>, vector<8x8xf32> -> vector<8x8xf32>
    %106 = tpu.reciprocal %103 {approx = true} : vector<8x1xf32> -> vector<8x1xf32>
    %107 = vector.broadcast %106 : vector<8x1xf32> to vector<8x8xf32>
    %108 = arith.mulf %105, %107 : vector<8x8xf32>
    %109 = vector.extract_strided_slice %45 {offsets = [0, 24], sizes = [8, 8], strides = [1, 1]} : vector<16x32xf32> to vector<8x8xf32>
    %110 = arith.truncf %109 : vector<8x8xf32> to vector<8x8xbf16>
    %111 = vector.extract_strided_slice %48 {offsets = [0, 24], sizes = [8, 8], strides = [1, 1]} : vector<16x32xf32> to vector<8x8xf32>
    %112 = arith.truncf %111 : vector<8x8xf32> to vector<8x8xbf16>
    %113 = vector.extract_strided_slice %51 {offsets = [0, 24], sizes = [8, 8], strides = [1, 1]} : vector<16x32xf32> to vector<8x8xf32>
    %114 = arith.truncf %113 : vector<8x8xf32> to vector<8x8xbf16>
    %cst_28 = arith.constant dense<0.000000e+00> : vector<8x8xf32>
    %115 = tpu.matmul %110, %112, %cst_28 {dimension_numbers = #tpu.dot_dimension_numbers<[1], [1], [0], [0], [0, 0, 1, 0], [], []>} : vector<8x8xbf16>, vector<8x8xbf16>, vector<8x8xf32> -> vector<8x8xf32>
    %cst_29 = arith.constant dense<0xFF800000> : vector<8xf32>
    %116 = vector.multi_reduction <maximumf>, %115, %cst_29 [1] : vector<8x8xf32> to vector<8xf32>
    %117 = vector.shape_cast %116 : vector<8xf32> to vector<8x1xf32>
    %118 = vector.broadcast %117 : vector<8x1xf32> to vector<8x8xf32>
    %119 = arith.subf %115, %118 : vector<8x8xf32>
    %120 = math.exp %119 : vector<8x8xf32>
    %cst_30 = arith.constant dense<0.000000e+00> : vector<8xf32>
    %121 = vector.multi_reduction <add>, %120, %cst_30 [1] : vector<8x8xf32> to vector<8xf32>
    %122 = vector.shape_cast %121 : vector<8xf32> to vector<8x1xf32>
    %123 = arith.truncf %120 : vector<8x8xf32> to vector<8x8xbf16>
    %cst_31 = arith.constant dense<0.000000e+00> : vector<8x8xf32>
    %124 = tpu.matmul %123, %114, %cst_31 {dimension_numbers = #tpu.dot_dimension_numbers<[1], [0], [0], [1], [0, 0, 1, 1], [], []>} : vector<8x8xbf16>, vector<8x8xbf16>, vector<8x8xf32> -> vector<8x8xf32>
    %125 = tpu.reciprocal %122 {approx = true} : vector<8x1xf32> -> vector<8x1xf32>
    %126 = vector.broadcast %125 : vector<8x1xf32> to vector<8x8xf32>
    %127 = arith.mulf %124, %126 : vector<8x8xf32>
    %128 = tpu.concatenate %70, %89, %108, %127 in 1 : vector<8x8xf32>, vector<8x8xf32>, vector<8x8xf32>, vector<8x8xf32> -> vector<8x32xf32>
    %129 = vector.extract_strided_slice %45 {offsets = [8, 0], sizes = [8, 8], strides = [1, 1]} : vector<16x32xf32> to vector<8x8xf32>
    %130 = arith.truncf %129 : vector<8x8xf32> to vector<8x8xbf16>
    %131 = vector.extract_strided_slice %48 {offsets = [8, 0], sizes = [8, 8], strides = [1, 1]} : vector<16x32xf32> to vector<8x8xf32>
    %132 = arith.truncf %131 : vector<8x8xf32> to vector<8x8xbf16>
    %133 = vector.extract_strided_slice %51 {offsets = [8, 0], sizes = [8, 8], strides = [1, 1]} : vector<16x32xf32> to vector<8x8xf32>
    %134 = arith.truncf %133 : vector<8x8xf32> to vector<8x8xbf16>
    %cst_32 = arith.constant dense<0.000000e+00> : vector<8x8xf32>
    %135 = tpu.matmul %130, %132, %cst_32 {dimension_numbers = #tpu.dot_dimension_numbers<[1], [1], [0], [0], [0, 0, 1, 0], [], []>} : vector<8x8xbf16>, vector<8x8xbf16>, vector<8x8xf32> -> vector<8x8xf32>
    %cst_33 = arith.constant dense<0xFF800000> : vector<8xf32>
    %136 = vector.multi_reduction <maximumf>, %135, %cst_33 [1] : vector<8x8xf32> to vector<8xf32>
    %137 = vector.shape_cast %136 : vector<8xf32> to vector<8x1xf32>
    %138 = vector.broadcast %137 : vector<8x1xf32> to vector<8x8xf32>
    %139 = arith.subf %135, %138 : vector<8x8xf32>
    %140 = math.exp %139 : vector<8x8xf32>
    %cst_34 = arith.constant dense<0.000000e+00> : vector<8xf32>
    %141 = vector.multi_reduction <add>, %140, %cst_34 [1] : vector<8x8xf32> to vector<8xf32>
    %142 = vector.shape_cast %141 : vector<8xf32> to vector<8x1xf32>
    %143 = arith.truncf %140 : vector<8x8xf32> to vector<8x8xbf16>
    %cst_35 = arith.constant dense<0.000000e+00> : vector<8x8xf32>
    %144 = tpu.matmul %143, %134, %cst_35 {dimension_numbers = #tpu.dot_dimension_numbers<[1], [0], [0], [1], [0, 0, 1, 1], [], []>} : vector<8x8xbf16>, vector<8x8xbf16>, vector<8x8xf32> -> vector<8x8xf32>
    %145 = tpu.reciprocal %142 {approx = true} : vector<8x1xf32> -> vector<8x1xf32>
    %146 = vector.broadcast %145 : vector<8x1xf32> to vector<8x8xf32>
    %147 = arith.mulf %144, %146 : vector<8x8xf32>
    %148 = vector.extract_strided_slice %45 {offsets = [8, 8], sizes = [8, 8], strides = [1, 1]} : vector<16x32xf32> to vector<8x8xf32>
    %149 = arith.truncf %148 : vector<8x8xf32> to vector<8x8xbf16>
    %150 = vector.extract_strided_slice %48 {offsets = [8, 8], sizes = [8, 8], strides = [1, 1]} : vector<16x32xf32> to vector<8x8xf32>
    %151 = arith.truncf %150 : vector<8x8xf32> to vector<8x8xbf16>
    %152 = vector.extract_strided_slice %51 {offsets = [8, 8], sizes = [8, 8], strides = [1, 1]} : vector<16x32xf32> to vector<8x8xf32>
    %153 = arith.truncf %152 : vector<8x8xf32> to vector<8x8xbf16>
    %cst_36 = arith.constant dense<0.000000e+00> : vector<8x8xf32>
    %154 = tpu.matmul %149, %151, %cst_36 {dimension_numbers = #tpu.dot_dimension_numbers<[1], [1], [0], [0], [0, 0, 1, 0], [], []>} : vector<8x8xbf16>, vector<8x8xbf16>, vector<8x8xf32> -> vector<8x8xf32>
    %cst_37 = arith.constant dense<0xFF800000> : vector<8xf32>
    %155 = vector.multi_reduction <maximumf>, %154, %cst_37 [1] : vector<8x8xf32> to vector<8xf32>
    %156 = vector.shape_cast %155 : vector<8xf32> to vector<8x1xf32>
    %157 = vector.broadcast %156 : vector<8x1xf32> to vector<8x8xf32>
    %158 = arith.subf %154, %157 : vector<8x8xf32>
    %159 = math.exp %158 : vector<8x8xf32>
    %cst_38 = arith.constant dense<0.000000e+00> : vector<8xf32>
    %160 = vector.multi_reduction <add>, %159, %cst_38 [1] : vector<8x8xf32> to vector<8xf32>
    %161 = vector.shape_cast %160 : vector<8xf32> to vector<8x1xf32>
    %162 = arith.truncf %159 : vector<8x8xf32> to vector<8x8xbf16>
    %cst_39 = arith.constant dense<0.000000e+00> : vector<8x8xf32>
    %163 = tpu.matmul %162, %153, %cst_39 {dimension_numbers = #tpu.dot_dimension_numbers<[1], [0], [0], [1], [0, 0, 1, 1], [], []>} : vector<8x8xbf16>, vector<8x8xbf16>, vector<8x8xf32> -> vector<8x8xf32>
    %164 = tpu.reciprocal %161 {approx = true} : vector<8x1xf32> -> vector<8x1xf32>
    %165 = vector.broadcast %164 : vector<8x1xf32> to vector<8x8xf32>
    %166 = arith.mulf %163, %165 : vector<8x8xf32>
    %167 = vector.extract_strided_slice %45 {offsets = [8, 16], sizes = [8, 8], strides = [1, 1]} : vector<16x32xf32> to vector<8x8xf32>
    %168 = arith.truncf %167 : vector<8x8xf32> to vector<8x8xbf16>
    %169 = vector.extract_strided_slice %48 {offsets = [8, 16], sizes = [8, 8], strides = [1, 1]} : vector<16x32xf32> to vector<8x8xf32>
    %170 = arith.truncf %169 : vector<8x8xf32> to vector<8x8xbf16>
    %171 = vector.extract_strided_slice %51 {offsets = [8, 16], sizes = [8, 8], strides = [1, 1]} : vector<16x32xf32> to vector<8x8xf32>
    %172 = arith.truncf %171 : vector<8x8xf32> to vector<8x8xbf16>
    %cst_40 = arith.constant dense<0.000000e+00> : vector<8x8xf32>
    %173 = tpu.matmul %168, %170, %cst_40 {dimension_numbers = #tpu.dot_dimension_numbers<[1], [1], [0], [0], [0, 0, 1, 0], [], []>} : vector<8x8xbf16>, vector<8x8xbf16>, vector<8x8xf32> -> vector<8x8xf32>
    %cst_41 = arith.constant dense<0xFF800000> : vector<8xf32>
    %174 = vector.multi_reduction <maximumf>, %173, %cst_41 [1] : vector<8x8xf32> to vector<8xf32>
    %175 = vector.shape_cast %174 : vector<8xf32> to vector<8x1xf32>
    %176 = vector.broadcast %175 : vector<8x1xf32> to vector<8x8xf32>
    %177 = arith.subf %173, %176 : vector<8x8xf32>
    %178 = math.exp %177 : vector<8x8xf32>
    %cst_42 = arith.constant dense<0.000000e+00> : vector<8xf32>
    %179 = vector.multi_reduction <add>, %178, %cst_42 [1] : vector<8x8xf32> to vector<8xf32>
    %180 = vector.shape_cast %179 : vector<8xf32> to vector<8x1xf32>
    %181 = arith.truncf %178 : vector<8x8xf32> to vector<8x8xbf16>
    %cst_43 = arith.constant dense<0.000000e+00> : vector<8x8xf32>
    %182 = tpu.matmul %181, %172, %cst_43 {dimension_numbers = #tpu.dot_dimension_numbers<[1], [0], [0], [1], [0, 0, 1, 1], [], []>} : vector<8x8xbf16>, vector<8x8xbf16>, vector<8x8xf32> -> vector<8x8xf32>
    %183 = tpu.reciprocal %180 {approx = true} : vector<8x1xf32> -> vector<8x1xf32>
    %184 = vector.broadcast %183 : vector<8x1xf32> to vector<8x8xf32>
    %185 = arith.mulf %182, %184 : vector<8x8xf32>
    %186 = vector.extract_strided_slice %45 {offsets = [8, 24], sizes = [8, 8], strides = [1, 1]} : vector<16x32xf32> to vector<8x8xf32>
    %187 = arith.truncf %186 : vector<8x8xf32> to vector<8x8xbf16>
    %188 = vector.extract_strided_slice %48 {offsets = [8, 24], sizes = [8, 8], strides = [1, 1]} : vector<16x32xf32> to vector<8x8xf32>
    %189 = arith.truncf %188 : vector<8x8xf32> to vector<8x8xbf16>
    %190 = vector.extract_strided_slice %51 {offsets = [8, 24], sizes = [8, 8], strides = [1, 1]} : vector<16x32xf32> to vector<8x8xf32>
    %191 = arith.truncf %190 : vector<8x8xf32> to vector<8x8xbf16>
    %cst_44 = arith.constant dense<0.000000e+00> : vector<8x8xf32>
    %192 = tpu.matmul %187, %189, %cst_44 {dimension_numbers = #tpu.dot_dimension_numbers<[1], [1], [0], [0], [0, 0, 1, 0], [], []>} : vector<8x8xbf16>, vector<8x8xbf16>, vector<8x8xf32> -> vector<8x8xf32>
    %cst_45 = arith.constant dense<0xFF800000> : vector<8xf32>
    %193 = vector.multi_reduction <maximumf>, %192, %cst_45 [1] : vector<8x8xf32> to vector<8xf32>
    %194 = vector.shape_cast %193 : vector<8xf32> to vector<8x1xf32>
    %195 = vector.broadcast %194 : vector<8x1xf32> to vector<8x8xf32>
    %196 = arith.subf %192, %195 : vector<8x8xf32>
    %197 = math.exp %196 : vector<8x8xf32>
    %cst_46 = arith.constant dense<0.000000e+00> : vector<8xf32>
    %198 = vector.multi_reduction <add>, %197, %cst_46 [1] : vector<8x8xf32> to vector<8xf32>
    %199 = vector.shape_cast %198 : vector<8xf32> to vector<8x1xf32>
    %200 = arith.truncf %197 : vector<8x8xf32> to vector<8x8xbf16>
    %cst_47 = arith.constant dense<0.000000e+00> : vector<8x8xf32>
    %201 = tpu.matmul %200, %191, %cst_47 {dimension_numbers = #tpu.dot_dimension_numbers<[1], [0], [0], [1], [0, 0, 1, 1], [], []>} : vector<8x8xbf16>, vector<8x8xbf16>, vector<8x8xf32> -> vector<8x8xf32>
    %202 = tpu.reciprocal %199 {approx = true} : vector<8x1xf32> -> vector<8x1xf32>
    %203 = vector.broadcast %202 : vector<8x1xf32> to vector<8x8xf32>
    %204 = arith.mulf %201, %203 : vector<8x8xf32>
    %205 = tpu.concatenate %147, %166, %185, %204 in 1 : vector<8x8xf32>, vector<8x8xf32>, vector<8x8xf32>, vector<8x8xf32> -> vector<8x32xf32>
    %206 = tpu.concatenate %128, %205 in 0 : vector<8x32xf32>, vector<8x32xf32> -> vector<16x32xf32>
    %207 = arith.truncf %206 : vector<16x32xf32> to vector<16x32xbf16>
    %c0_48 = arith.constant 0 : index
    %c0_49 = arith.constant 0 : index
    %c0_50 = arith.constant 0 : index
    %208 = vector.load %arg3[%c0_48, %c0_49, %c0_50] : memref<1x32x32xbf16, #tpu.memory_space<vmem>>, vector<1x32x32xbf16>
    %209 = vector.shape_cast %208 : vector<1x32x32xbf16> to vector<32x32xbf16>
    %cst_51 = arith.constant dense<0.000000e+00> : vector<16x32xf32>
    %210 = tpu.matmul %207, %209, %cst_51 {dimension_numbers = #tpu.dot_dimension_numbers<[1], [0], [0], [1], [0, 0, 1, 1], [], []>} : vector<16x32xbf16>, vector<32x32xbf16>, vector<16x32xf32> -> vector<16x32xf32>
    %211 = vector.broadcast %11 : vector<1x32xf32> to vector<16x32xf32>
    %212 = arith.addf %210, %211 : vector<16x32xf32>
    %213 = arith.addf %3, %212 : vector<16x32xf32>
    %cst_52 = arith.constant dense<0.000000e+00> : vector<16xf32>
    %214 = vector.multi_reduction <add>, %213, %cst_52 [1] : vector<16x32xf32> to vector<16xf32>
    %215 = vector.shape_cast %214 : vector<16xf32> to vector<16x1xf32>
    %cst_53 = arith.constant 3.200000e+01 : f32
    %216 = vector.broadcast %cst_53 : f32 to vector<16x1xf32>
    %217 = arith.divf %215, %216 : vector<16x1xf32>
    %218 = vector.broadcast %217 : vector<16x1xf32> to vector<16x32xf32>
    %219 = arith.subf %213, %218 : vector<16x32xf32>
    %220 = arith.mulf %219, %219 : vector<16x32xf32>
    %cst_54 = arith.constant dense<0.000000e+00> : vector<16xf32>
    %221 = vector.multi_reduction <add>, %220, %cst_54 [1] : vector<16x32xf32> to vector<16xf32>
    %222 = vector.shape_cast %221 : vector<16xf32> to vector<16x1xf32>
    %cst_55 = arith.constant 3.200000e+01 : f32
    %223 = vector.broadcast %cst_55 : f32 to vector<16x1xf32>
    %224 = arith.divf %222, %223 : vector<16x1xf32>
    %225 = vector.broadcast %217 : vector<16x1xf32> to vector<16x32xf32>
    %226 = arith.subf %213, %225 : vector<16x32xf32>
    %cst_56 = arith.constant 9.99999974E-6 : f32
    %227 = vector.broadcast %cst_56 : f32 to vector<16x1xf32>
    %228 = arith.addf %224, %227 : vector<16x1xf32>
    %229 = math.rsqrt %228 : vector<16x1xf32>
    %230 = vector.broadcast %229 : vector<16x1xf32> to vector<16x32xf32>
    %231 = arith.mulf %226, %230 : vector<16x32xf32>
    %232 = vector.broadcast %12 : vector<1x32xf32> to vector<16x32xf32>
    %233 = arith.mulf %231, %232 : vector<16x32xf32>
    %234 = vector.broadcast %13 : vector<1x32xf32> to vector<16x32xf32>
    %235 = arith.addf %233, %234 : vector<16x32xf32>
    %236 = arith.truncf %235 : vector<16x32xf32> to vector<16x32xbf16>
    %c0_57 = arith.constant 0 : index
    %c0_58 = arith.constant 0 : index
    %c0_59 = arith.constant 0 : index
    %237 = vector.load %arg4[%c0_57, %c0_58, %c0_59] : memref<1x32x128xbf16, #tpu.memory_space<vmem>>, vector<1x32x128xbf16>
    %238 = vector.shape_cast %237 : vector<1x32x128xbf16> to vector<32x128xbf16>
    %cst_60 = arith.constant dense<0.000000e+00> : vector<16x128xf32>
    %239 = tpu.matmul %236, %238, %cst_60 {dimension_numbers = #tpu.dot_dimension_numbers<[1], [0], [0], [1], [0, 0, 1, 1], [], []>} : vector<16x32xbf16>, vector<32x128xbf16>, vector<16x128xf32> -> vector<16x128xf32>
    %240 = vector.broadcast %16 : vector<1x128xf32> to vector<16x128xf32>
    %241 = arith.addf %239, %240 : vector<16x128xf32>
    %cst_61 = arith.constant 0.000000e+00 : f32
    %242 = vector.broadcast %cst_61 : f32 to vector<16x128xf32>
    %243 = arith.maximumf %241, %242 : vector<16x128xf32>
    %244 = arith.truncf %243 : vector<16x128xf32> to vector<16x128xbf16>
    %c0_62 = arith.constant 0 : index
    %c0_63 = arith.constant 0 : index
    %c0_64 = arith.constant 0 : index
    %245 = vector.load %arg5[%c0_62, %c0_63, %c0_64] : memref<1x128x32xbf16, #tpu.memory_space<vmem>>, vector<1x128x32xbf16>
    %246 = vector.shape_cast %245 : vector<1x128x32xbf16> to vector<128x32xbf16>
    %cst_65 = arith.constant dense<0.000000e+00> : vector<16x32xf32>
    %247 = tpu.matmul %244, %246, %cst_65 {dimension_numbers = #tpu.dot_dimension_numbers<[1], [0], [0], [1], [0, 0, 1, 1], [], []>} : vector<16x128xbf16>, vector<128x32xbf16>, vector<16x32xf32> -> vector<16x32xf32>
    %248 = vector.broadcast %14 : vector<1x32xf32> to vector<16x32xf32>
    %249 = arith.addf %247, %248 : vector<16x32xf32>
    %250 = arith.addf %213, %249 : vector<16x32xf32>
    %c0_66 = arith.constant 0 : index
    %c0_67 = arith.constant 0 : index
    %251 = vector.load %arg9[%c0_66, %c0_67] : memref<16x32xf32, #tpu.memory_space<vmem>>, vector<16x32xf32>
    tpu.vector_store %arg9[%c0_66, %c0_67], %250 {strides = array<i32>} : memref<16x32xf32, #tpu.memory_space<vmem>>, vector<16x32xf32>,
    %c1_i32 = arith.constant 1 : i32
    %252 = arith.cmpi eq, %arg0, %c1_i32 : i32
    %253 = arith.extui %252 : i1 to i32
    %c0_i32_68 = arith.constant 0 : i32
    %254 = arith.cmpi ne, %253, %c0_i32_68 : i32
    scf.if %254 {
      %c0_69 = arith.constant 0 : index
      %c0_70 = arith.constant 0 : index
      %255 = vector.load %arg9[%c0_69, %c0_70] : memref<16x32xf32, #tpu.memory_space<vmem>>, vector<16x32xf32>
      %c0_71 = arith.constant 0 : index
      %c0_72 = arith.constant 0 : index
      %256 = vector.load %arg8[%c0_71, %c0_72] : memref<2x32xf32, #tpu.memory_space<vmem>>, vector<1x32xf32>
      %c1 = arith.constant 1 : index
      %c0_73 = arith.constant 0 : index
      %257 = vector.load %arg8[%c1, %c0_73] : memref<2x32xf32, #tpu.memory_space<vmem>>, vector<1x32xf32>
      %cst_74 = arith.constant dense<0.000000e+00> : vector<16xf32>
      %258 = vector.multi_reduction <add>, %255, %cst_74 [1] : vector<16x32xf32> to vector<16xf32>
      %259 = vector.shape_cast %258 : vector<16xf32> to vector<16x1xf32>
      %cst_75 = arith.constant 3.200000e+01 : f32
      %260 = vector.broadcast %cst_75 : f32 to vector<16x1xf32>
      %261 = arith.divf %259, %260 : vector<16x1xf32>
      %262 = vector.broadcast %261 : vector<16x1xf32> to vector<16x32xf32>
      %263 = arith.subf %255, %262 : vector<16x32xf32>
      %264 = arith.mulf %263, %263 : vector<16x32xf32>
      %cst_76 = arith.constant dense<0.000000e+00> : vector<16xf32>
      %265 = vector.multi_reduction <add>, %264, %cst_76 [1] : vector<16x32xf32> to vector<16xf32>
      %266 = vector.shape_cast %265 : vector<16xf32> to vector<16x1xf32>
      %cst_77 = arith.constant 3.200000e+01 : f32
      %267 = vector.broadcast %cst_77 : f32 to vector<16x1xf32>
      %268 = arith.divf %266, %267 : vector<16x1xf32>
      %269 = vector.broadcast %261 : vector<16x1xf32> to vector<16x32xf32>
      %270 = arith.subf %255, %269 : vector<16x32xf32>
      %cst_78 = arith.constant 9.99999974E-6 : f32
      %271 = vector.broadcast %cst_78 : f32 to vector<16x1xf32>
      %272 = arith.addf %268, %271 : vector<16x1xf32>
      %273 = math.rsqrt %272 : vector<16x1xf32>
      %274 = vector.broadcast %273 : vector<16x1xf32> to vector<16x32xf32>
      %275 = arith.mulf %270, %274 : vector<16x32xf32>
      %276 = vector.broadcast %256 : vector<1x32xf32> to vector<16x32xf32>
      %277 = arith.mulf %275, %276 : vector<16x32xf32>
      %278 = vector.broadcast %257 : vector<1x32xf32> to vector<16x32xf32>
      %279 = arith.addf %277, %278 : vector<16x32xf32>
      %c0_79 = arith.constant 0 : index
      %c0_80 = arith.constant 0 : index
      %280 = vector.load %arg9[%c0_79, %c0_80] : memref<16x32xf32, #tpu.memory_space<vmem>>, vector<16x32xf32>
      tpu.vector_store %arg9[%c0_79, %c0_80], %279 {strides = array<i32>} : memref<16x32xf32, #tpu.memory_space<vmem>>, vector<16x32xf32>,
    } else {
    }
    return
  }
  func.func @transform_0(%arg0: i32) -> (i32, i32) {
    %c0_i32 = arith.constant 0 : i32
    %c0_i32_0 = arith.constant 0 : i32
    %c0_i32_1 = arith.constant 0 : i32
    return %c0_i32, %c0_i32_0 : i32, i32
  }
  func.func @transform_1(%arg0: i32) -> (i32, i32, i32) {
    %c0_i32 = arith.constant 0 : i32
    %c0_i32_0 = arith.constant 0 : i32
    %c0_i32_1 = arith.constant 0 : i32
    return %arg0, %c0_i32, %c0_i32_0 : i32, i32, i32
  }
  func.func @transform_2(%arg0: i32) -> (i32, i32, i32) {
    %c0_i32 = arith.constant 0 : i32
    %c0_i32_0 = arith.constant 0 : i32
    %c0_i32_1 = arith.constant 0 : i32
    return %arg0, %c0_i32, %c0_i32_0 : i32, i32, i32
  }
  func.func @transform_3(%arg0: i32) -> (i32, i32, i32) {
    %c0_i32 = arith.constant 0 : i32
    %c0_i32_0 = arith.constant 0 : i32
    %c0_i32_1 = arith.constant 0 : i32
    return %arg0, %c0_i32, %c0_i32_0 : i32, i32, i32
  }
  func.func @transform_4(%arg0: i32) -> (i32, i32, i32) {
    %c0_i32 = arith.constant 0 : i32
    %c0_i32_0 = arith.constant 0 : i32
    %c0_i32_1 = arith.constant 0 : i32
    return %arg0, %c0_i32, %c0_i32_0 : i32, i32, i32
  }
  func.func @transform_5(%arg0: i32) -> (i32, i32, i32) {
    %c0_i32 = arith.constant 0 : i32
    %c0_i32_0 = arith.constant 0 : i32
    %c0_i32_1 = arith.constant 0 : i32
    return %arg0, %c0_i32, %c0_i32_0 : i32, i32, i32
  }
  func.func @transform_6(%arg0: i32) -> (i32, i32, i32) {
    %c0_i32 = arith.constant 0 : i32
    %c0_i32_0 = arith.constant 0 : i32
    %c0_i32_1 = arith.constant 0 : i32
    return %arg0, %c0_i32, %c0_i32_0 : i32, i32, i32
  }
  func.func @transform_7(%arg0: i32) -> (i32, i32) {
    %c0_i32 = arith.constant 0 : i32
    %c0_i32_0 = arith.constant 0 : i32
    %c0_i32_1 = arith.constant 0 : i32
    return %c0_i32, %c0_i32_0 : i32, i32
  }
  func.func @transform_8(%arg0: i32) -> (i32, i32) {
    %c0_i32 = arith.constant 0 : i32
    %c0_i32_0 = arith.constant 0 : i32
    %c0_i32_1 = arith.constant 0 : i32
    return %c0_i32, %c0_i32_0 : i32, i32
  }
}

</mosaic_0001>

<bundles_post_ra>
// kernel: transformer_encoder_forward.1
= control target key start
LH: loop header
LB: loop body
LE: loop exit
PB: predicated region body
PF: predicated region fallthrough
CT: control target
= control target key end

     0   :  { %s2288_s27 = smov 0   ;;  %s2631_s0 = inlined_call_operand.vmem [shape: f32[16,32], index: 0, kind: input, shape index: {}]   ;;  %s2632_s1 = inlined_call_operand.vmem [shape: bf16[2,32,96], index: 1, kind: input, shape index: {}]   ;;  %s2633_s2 = inlined_call_operand.vmem [shape: bf16[2,32,32], index: 2, kind: input, shape index: {}]   ;;  %s2634_s3 = inlined_call_operand.vmem [shape: bf16[2,32,128], index: 3, kind: input, shape index: {}]   ;;  %s2635_s4 = inlined_call_operand.vmem [shape: bf16[2,128,32], index: 4, kind: input, shape index: {}]   ;;  %s2636_s5 = inlined_call_operand.vmem [shape: f32[2,9,32], index: 5, kind: input, shape index: {}]   ;;  %s2637_s6 = inlined_call_operand.vmem [shape: f32[2,1,128], index: 6, kind: input, shape index: {}]   ;;  %s2638_s7 = inlined_call_operand.vmem [shape: f32[2,32], index: 7, kind: input, shape index: {}]   ;;  %s2639_s8 = inlined_call_operand.vmem [shape: f32[16,32], index: 8, kind: output, shape index: {}]  }
   0x1 LB: > { %s2294_s28 = sadd.s32 4294967295, %s2224_s27   ;;  %p1873_p0 = scmp.ge.s32.totalorder %s2224_s27, 1  ;;  %s2224_s27 = sphi %s2288_s27, %s18_s27  }
   0x2   : > { %p305_p1 = scmp.lt.s32.totalorder %s2224_s27, 3 }
   0x4   : > { %p306_p2 = pnand %p1873_p0, %p305_p1 }
   0x5   : > { %p357_p3 = scmp.lt.s32.totalorder (!%p306_p2), %s2294_s28, 1  ;;  %p1884_p4 = scmp.ne.s32.totalorder (!%p306_p2), %s2294_s28, 0 }
   0x6   : > { %309 = sbr.rel (%p306_p2) target bundleno = 2800 (0xaf0), region = 52 }
   0xd   : > { %s2300_s29 = scalar_select %p357_p3, %s2294_s28, 1 }
   0xe   : > { %389 = sbr.rel (%p1884_p4) target bundleno = 21 (0x15), region = 56  ;;  %v390_v0 = vld [vmem:[%s2631_s0] sm:$0xff] (!%p1884_p4)  ;;  %vm392_vm0 = vcmask (!%p1884_p4), 261120   ;;  %v391_v1 = vld [vmem:[%s2631_s0 + $0x8] sm:$0xff] (!%p1884_p4) }
   0xf   : > { %s1925_s30 = sshll.u32 %s2300_s29, 4  ;;  %s1928_s9 = sshll.u32 %s2300_s29, 6  ;;  %393 = vst.msk [vmem:[%s2639_s8] sm:$0xff] (!%p1884_p4), %vm392_vm0, %v390_v0  ;;  %394 = vst.msk [vmem:[%s2639_s8 + $0x8] sm:$0xff] (!%p1884_p4), %vm392_vm0, %v391_v1 }
  0x10   : > { %s2307_s12 = scalar_lea.vmem %s2632_s1, %s1925_s30  ;;  %s2312_s15 = scalar_lea.vmem %s2633_s2, %s1925_s30 }
  0x11   : > { %s2317_s18 = scalar_lea.vmem %s2634_s3, %s1925_s30  ;;  %s2322_s21 = scalar_lea.vmem %s2635_s4, %s1928_s9 }
  0x12   : > { %s2327_s24 = scalar_lea.vmem %s2636_s5, %s1925_s30  ;;  %s384_s10 = scalar_lea.vmem %s2637_s6, %s2300_s29 }
  0x15 PF: > { %vm400_vm1 = vcmask 261120   ;;  %v2160_v16 = vld [vmem:[%s2307_s12] sm:$0xff]   ;;  %v2226_v17 = vmov 0.0   ;;  %v2161_v18 = vld [vmem:[%s2307_s12 + $0x8] sm:$0xff]   ;;  %vm2227_vm2 = vmmov 0   ;;  %v428_v19 = vlaneseq  ;;  %s2228_s12 = smov 32  }
  0x16   : > { %v2349_v2 = vld [vmem:[%s2639_s8] sm:$0xff]  ;;  %v2354_v3 = vld [vmem:[%s2639_s8 + $0x8] sm:$0xff]  ;;  %1980 = vmatprep.subr.bf16.mxu0 %v2226_v17  ;;  %2000 = vmatprep.subr.bf16.mxu1 %v2226_v17  ;;  %s2229_s26 = smov 80   ;;  %s2230_s11 = smov 96   ;;  %vm533_vm3 = vcmask 64512   ;;  %vm596_vm4 = vcmask 1043456  }
  0x17   : > { %v401_v4 = vsel %vm400_vm1, %v2349_v2, 0.0  ;;  %v404_v5 = vsel %vm400_vm1, %v2354_v3, 0.0  ;;  %1981 = vmatpush3.bf16.msra.mxu0 %v2160_v16  ;;  %1984 = vmatprep.mubr.msk.bf16.mxu0 %vm2227_vm2, %v2226_v17  ;;  %v2373_v20 = vshrl.u32 %v428_v19, 7  ;;  %v2378_v22 = vld [vmem:[%s2327_s24] sm:$0xff]  ;;  %s2231_s13 = smov 72   ;;  %s2232_s14 = smov 88  }
  0x18   : > { %402 = vadd.xlane.f32.xlu0 %v401_v4  ;;  %1982 = vmatprep.subr.bf16.mxu0 %v2226_v17  ;;  %s2233_s9 = smov 120   ;;  %s2234_s16 = smov 112   ;;  %vm986_vm5 = vcmask 130048   ;;  %vm988_vm6 = vcmask 195584  }
  0x19   : > { %2002 = vmatprep.mubr.msk.bf16.mxu1 %vm2227_vm2, %v2226_v17  ;;  %v509_v21 = vsub.s32 3, %v2373_v20  ;;  %v430_v30 = vsub.s32 0, %v2373_v20  ;;  %v436_v34 = vsub.s32 1, %v2373_v20  ;;  %v503_v44 = vsub.s32 2, %v2373_v20  ;;  %s2235_s17 = smov 104   ;;  %s2236_s30 = smov 64  }
  0x1a   : > { %v519_v58 = vsub.s32 4, %v2373_v20  ;;  %s2237_s19 = smov 56   ;;  %s2238_s20 = smov 48  }
  0x1b   : > { %1983 = vmatpush3.bf16.msra.mxu0 %v2161_v18  ;;  %v510_v23 = vrot.slane %v2378_v22, %v509_v21  ;;  %v431_v33 = vrot.slane %v2378_v22, %v430_v30  ;;  %v437_v38 = vrot.slane %v2378_v22, %v436_v34  ;;  %v504_v49 = vrot.slane %v2378_v22, %v503_v44  ;;  %s2239_s22 = smov 40   ;;  %s2240_s23 = smov 8  }
  0x1c   : > { %405 = vadd.xlane.f32.xlu0 %v404_v5  ;;  %1988 = vmatprep.subr.bf16.mxu0 %v2226_v17  ;;  %v520_v59 = vrot.slane %v2378_v22, %v519_v58  ;;  %s2241_s25 = smov 16   ;;  %p1920_p5 = scmp.ne.s32.totalorder %s2294_s28, 1 }
  0x32   : > { %512 = vrot.lane.b32.xlu0 %v510_v23, %s2228_s12  ;;  %s2242_s12 = smov 24  }
  0xa5   : > { %v403_v6 = vpop.xlane.xlu0 %402 }
  0xa6   : > { %v408_v7 = vmul.f32 0.03125, %v403_v6 }
  0xa8   : > { %v410_v8 = vsub.f32 %v2349_v2, %v408_v7 }
  0xa9   : > { %v406_v9 = vpop.xlane.xlu0 %405 }
  0xaa   : > { %v409_v10 = vmul.f32 0.03125, %v406_v9  ;;  %v412_v11 = vmul.f32 %v410_v8, %v410_v8 }
  0xac   : > { %v411_v12 = vsub.f32 %v2354_v3, %v409_v10  ;;  %v414_v13 = vsel %vm400_vm1, %v412_v11, 0.0 }
  0xad   : > { %415 = vadd.xlane.f32.xlu1 %v414_v13  ;;  %v513_v43 = vpop.permute.xlu0 %512 }
  0xae   : > { %v413_v14 = vmul.f32 %v411_v12, %v411_v12 }
  0xb0   : > { %v417_v15 = vsel %vm400_vm1, %v413_v14, 0.0 }
  0xb1   : > { %418 = vadd.xlane.f32.xlu1 %v417_v15 }
 0x13a   : > { %v416_v24 = vpop.xlane.xlu1 %415 }
 0x13b   : > { %v420_v25 = vmul.f32 0.03125, %v416_v24 }
 0x13d   : > { %v422_v26 = vadd.f32 1e-05, %v420_v25 }
 0x13e   : > { %v419_v27 = vpop.xlane.xlu1 %418 }
 0x13f   : > { %2174 = vrsqrt.f32 %v422_v26  ;;  %v421_v28 = vmul.f32 0.03125, %v419_v27 }
 0x141   : > { %v423_v29 = vadd.f32 1e-05, %v421_v28 }
 0x143   : > { %2176 = vrsqrt.f32 %v423_v29 }
 0x149   : > { %v2175_v31 = vpop.eup %2174 }
 0x14a   : > { %v426_v32 = vmul.f32 %v2175_v31, %v410_v8 }
 0x14c   : > { %v432_v37 = vmul.f32 %v431_v33, %v426_v32 }
 0x14d   : > { %v2177_v35 = vpop.eup %2176 }
 0x14e   : > { %v427_v36 = vmul.f32 %v2177_v35, %v411_v12  ;;  %v438_v40 = vadd.f32 %v437_v38, %v432_v37 }
 0x150   : > { %v433_v39 = vmul.f32 %v431_v33, %v427_v36 }
 0x152   : > { %v439_v41 = vadd.f32 %v437_v38, %v433_v39 }
 0x154   : > { %v440_v42 = vpack.c.bf16 %v439_v41, %v438_v40 }
 0x156   : > { %1985 = vmatmul.mubr.msk.bf16.vlgmr.msra.gmra.mrb[0].mxu0 %vm400_vm1, %v440_v42 }
 0x157   : > { %1990 = vmatprep.mubr.msk.bf16.mxu0 %vm2227_vm2, %v2226_v17 }
 0x229   : > { %v2389_v45 = vpop.f32.mrb[0].mxu0 }
 0x22a   : > { %v515_v46 = vadd.f32 %v513_v43, %v2389_v45  ;;  %v1986_v47 = vpop.f32.mrb[1].mxu0  ;;  %v505_v52 = vadd.f32 %v504_v49, %v2389_v45 }
 0x22b   : > { %v2392_v48 = vpop.f32.mrb[2].mxu0 }
 0x22c   : > { %v528_v50 = vpack.c.bf16 %v515_v46, %v515_v46  ;;  %v1987_v51 = vpop.f32.mrb[3].mxu0  ;;  %v516_v53 = vadd.f32 %v513_v43, %v2392_v48  ;;  %v527_v54 = vpack.c.bf16 %v505_v52, %v505_v52  ;;  %v506_v55 = vadd.f32 %v504_v49, %v2392_v48 }
 0x22e   : > { %755 = vrot.lane.b32.xlu0 %v528_v50, %s2229_s26  ;;  %531 = vrot.lane.b32.xlu1 %v528_v50, %s2230_s11  ;;  %v991_v56 = vpack.c.bf16 %v516_v53, %v516_v53  ;;  %v990_v57 = vpack.c.bf16 %v506_v55, %v506_v55 }
 0x232   : > { %865 = vrot.lane.b32.xlu0 %v528_v50, %s2231_s13  ;;  %645 = vrot.lane.b32.xlu1 %v528_v50, %s2232_s14 }
 0x236   : > { %994 = vrot.lane.b32.xlu0 %v991_v56, %s2230_s11  ;;  %643 = vrot.lane.b32.xlu1 %v527_v54, %s2233_s9 }
 0x23a   : > { %1104 = vrot.lane.b32.xlu0 %v990_v57, %s2233_s9  ;;  %753 = vrot.lane.b32.xlu1 %v527_v54, %s2234_s16 }
 0x23e   : > { %1214 = vrot.lane.b32.xlu0 %v990_v57, %s2234_s16  ;;  %863 = vrot.lane.b32.xlu1 %v527_v54, %s2235_s17 }
 0x242   : > { %1324 = vrot.lane.b32.xlu0 %v990_v57, %s2235_s17  ;;  %1106 = vrot.lane.b32.xlu1 %v991_v56, %s2232_s14 }
 0x246   : > { %1216 = vrot.lane.b32.xlu1 %v991_v56, %s2229_s26 }
 0x24a   : > { %1326 = vrot.lane.b32.xlu1 %v991_v56, %s2231_s13 }
 0x24e   : > { %522 = vrot.lane.b32.xlu1 %v520_v59, %s2236_s30 }
 0x2a0   : > { %v532_v60 = vpop.permute.xlu1 %531  ;;  %v756_v1 = vpop.permute.xlu0 %755 }
 0x2a1   : > { %v538_v61 = vsel %vm533_vm3, %v532_v60, 0  ;;  %v761_v5 = vsel %vm533_vm3, %v756_v1, 0 }
 0x2a2   : > { %1989 = vmatpush3.bf16.xpose.msra.mxu0 %v538_v61 }
 0x2a3   : > { %1994 = vmatprep.subr.bf16.mxu0 %v2226_v17 }
 0x2a4   : > { %v646_v62 = vpop.permute.xlu1 %645  ;;  %v866_v7 = vpop.permute.xlu0 %865 }
 0x2a5   : > { %v651_v63 = vsel %vm533_vm3, %v646_v62, 0  ;;  %v871_v9 = vsel %vm533_vm3, %v866_v7, 0 }
 0x2a6   : > { %2001 = vmatpush3.bf16.xpose.msra.mxu1 %v651_v63 }
 0x2a7   : > { %2012 = vmatprep.subr.bf16.mxu1 %v2226_v17 }
 0x2a8   : > { %v644_v0 = vpop.permute.xlu1 %643  ;;  %v995_v11 = vpop.permute.xlu0 %994 }
 0x2a9   : > { %1991 = vmatmul.mubr.msk.bf16.vlgmr.msra.gmra.mrb[4].mxu0 %vm533_vm3, %v527_v54  ;;  %v1000_v13 = vsel %vm533_vm3, %v995_v11, 0 }
 0x2aa   : > { %1996 = vmatprep.mubr.msk.bf16.mxu0 %vm2227_vm2, %v2226_v17 }
 0x2ac   : > { %v754_v4 = vpop.permute.xlu1 %753  ;;  %v1105_v19 = vpop.permute.xlu0 %1104 }
 0x2ad   : > { %2003 = vmatmul.mubr.msk.bf16.vlgmr.msra.gmra.mrb[0].mxu1 %vm533_vm3, %v644_v0 }
 0x2ae   : > { %2013 = vmatpush3.bf16.xpose.msra.mxu1 %v761_v5  ;;  %2014 = vmatprep.mubr.msk.bf16.mxu1 %vm2227_vm2, %v2226_v17 }
 0x2af   : > { %2024 = vmatprep.subr.bf16.mxu1 %v2226_v17 }
 0x2b0   : > { %v864_v6 = vpop.permute.xlu1 %863  ;;  %v1215_v23 = vpop.permute.xlu0 %1214 }
 0x2b4   : > { %v1107_v8 = vpop.permute.xlu1 %1106  ;;  %v1325_v25 = vpop.permute.xlu0 %1324 }
 0x2b5   : > { %2015 = vmatmul.mubr.msk.bf16.vlgmr.msra.gmra.mrb[4].mxu1 %vm533_vm3, %v754_v4  ;;  %v1112_v18 = vsel %vm533_vm3, %v1107_v8, 0 }
 0x2b6   : > { %2025 = vmatpush3.bf16.xpose.msra.mxu1 %v871_v9  ;;  %2026 = vmatprep.mubr.msk.bf16.mxu1 %vm2227_vm2, %v2226_v17 }
 0x2b7   : > { %2036 = vmatprep.subr.bf16.mxu1 %v2226_v17 }
 0x2b8   : > { %v1217_v10 = vpop.permute.xlu1 %1216 }
 0x2b9   : > { %v1222_v21 = vsel %vm533_vm3, %v1217_v10, 0 }
 0x2bc   : > { %v1327_v12 = vpop.permute.xlu1 %1326 }
 0x2bd   : > { %2027 = vmatmul.mubr.msk.bf16.vlgmr.msra.gmra.mrb[8].mxu1 %vm533_vm3, %v864_v6  ;;  %v1332_v24 = vsel %vm533_vm3, %v1327_v12, 0 }
 0x2be   : > { %2037 = vmatpush3.bf16.xpose.msra.mxu1 %v1000_v13  ;;  %2038 = vmatprep.mubr.msk.bf16.mxu1 %vm2227_vm2, %v2226_v17 }
 0x2bf   : > { %2048 = vmatprep.subr.bf16.mxu1 %v2226_v17 }
 0x2c0   : > { %v523_v14 = vpop.permute.xlu1 %522 }
 0x2c1   : > { %v525_v15 = vadd.f32 %v523_v14, %v2389_v45  ;;  %v526_v43 = vadd.f32 %v523_v14, %v2392_v48 }
 0x2c3   : > { %v2424_v16 = vpack.c.bf16 %v525_v15, %v525_v15  ;;  %v992_v45 = vpack.c.bf16 %v526_v43, %v526_v43 }
 0x2c5   : > { %2039 = vmatmul.mubr.msk.bf16.vlgmr.msra.gmra.mrb[12].mxu1 %vm533_vm3, %v990_v57  ;;  %703 = vrot.lane.b32.xlu1 %v2424_v16, %s2237_s19 }
 0x2c6   : > { %591 = vrot.lane.b32.xlu0 %v2424_v16, %s2236_s30  ;;  %2049 = vmatpush3.bf16.xpose.msra.mxu1 %v1112_v18 }
 0x2c7   : > { %2050 = vmatprep.mubr.msk.bf16.mxu1 %vm2227_vm2, %v2226_v17  ;;  %2060 = vmatprep.subr.bf16.mxu1 %v2226_v17 }
 0x2ca   : > { %813 = vrot.lane.b32.xlu0 %v2424_v16, %s2238_s20 }
 0x2cd   : > { %2051 = vmatmul.mubr.msk.bf16.vlgmr.msra.gmra.mrb[16].mxu1 %vm533_vm3, %v1105_v19 }
 0x2ce   : > { %2061 = vmatpush3.bf16.xpose.msra.mxu1 %v1222_v21  ;;  %2062 = vmatprep.mubr.msk.bf16.mxu1 %vm2227_vm2, %v2226_v17 }
 0x2cf   : > { %2072 = vmatprep.subr.bf16.mxu1 %v2226_v17 }
 0x2d5   : > { %2063 = vmatmul.mubr.msk.bf16.vlgmr.msra.gmra.mrb[20].mxu1 %vm533_vm3, %v1215_v23 }
 0x2d6   : > { %2073 = vmatpush3.bf16.xpose.msra.mxu1 %v1332_v24  ;;  %2074 = vmatprep.mubr.msk.bf16.mxu1 %vm2227_vm2, %v2226_v17 }
 0x2d7   : > { %2084 = vmatprep.subr.bf16.mxu1 %v2226_v17 }
 0x2dd   : > { %2075 = vmatmul.mubr.msk.bf16.vlgmr.msra.gmra.mrb[24].mxu1 %vm533_vm3, %v1325_v25 }
 0x2de   : > { %2088 = vmatprep.mubr.msk.bf16.mxu1 %vm2227_vm2, %v2226_v17 }
 0x337   : > { %v704_v9 = vpop.permute.xlu1 %703 }
 0x338   : > { %v592_v26 = vpop.permute.xlu0 %591  ;;  %v709_v24 = vsel %vm596_vm4, %v704_v9, 0 }
 0x339   : > { %v598_v27 = vsel %vm596_vm4, %v592_v26, 0 }
 0x33a   : > { %1995 = vmatpush3.bf16.msra.mxu0 %v598_v27 }
 0x33b   : > { %2006 = vmatprep.subr.bf16.mxu0 %v2226_v17 }
 0x33c   : > { %v814_v8 = vpop.permute.xlu0 %813 }
 0x37c   : > { %v574_v28 = vpop.f32.mrb[4].mxu0 }
 0x37d   : > { %v1992_v29 = vpop.f32.mrb[5].mxu0  ;;  %v580_v30 = vsel %vm533_vm3, %v574_v28, -inf }
 0x37e   : > { %v577_v31 = vpop.f32.mrb[6].mxu0  ;;  %581 = vmax.xlane.f32.xlu0 %v580_v30 }
 0x37f   : > { %v1993_v32 = vpop.f32.mrb[7].mxu0  ;;  %v819_v31 = vsel %vm596_vm4, %v814_v8, 0 }
 0x380   : > { %v687_v33 = vpop.f32.mrb[0].mxu1 }
 0x381   : > { %v2004_v34 = vpop.f32.mrb[1].mxu1  ;;  %v693_v35 = vsel %vm533_vm3, %v687_v33, -inf }
 0x382   : > { %v690_v36 = vpop.f32.mrb[2].mxu1  ;;  %694 = vmax.xlane.f32.xlu1 %v693_v35 }
 0x383   : > { %v2005_v37 = vpop.f32.mrb[3].mxu1 }
 0x388   : > { %v797_v38 = vpop.f32.mrb[4].mxu1 }
 0x389   : > { %v2016_v39 = vpop.f32.mrb[5].mxu1  ;;  %v803_v40 = vsel %vm533_vm3, %v797_v38, -inf }
 0x38a   : > { %v800_v41 = vpop.f32.mrb[6].mxu1  ;;  %804 = vmax.xlane.f32.xlu0 %v803_v40 }
 0x38b   : > { %v2017_v42 = vpop.f32.mrb[7].mxu1 }
 0x390   : > { %v2456_v44 = vpop.f32.mrb[8].mxu1 }
 0x391   : > { %v2028_v46 = vpop.f32.mrb[9].mxu1  ;;  %v913_v47 = vsel %vm533_vm3, %v2456_v44, -inf }
 0x392   : > { %v910_v49 = vpop.f32.mrb[10].mxu1  ;;  %914 = vmax.xlane.f32.xlu0 %v913_v47 }
 0x393   : > { %v2029_v50 = vpop.f32.mrb[11].mxu1  ;;  %1053 = vrot.lane.b32.xlu1 %v992_v45, %s2236_s30 }
 0x398   : > { %v2461_v51 = vpop.f32.mrb[12].mxu1 }
 0x399   : > { %v2040_v52 = vpop.f32.mrb[13].mxu1  ;;  %v1042_v4 = vsel %vm533_vm3, %v2461_v51, -inf }
 0x39a   : > { %v1039_v53 = vpop.f32.mrb[14].mxu1 }
 0x39b   : > { %v2041_v54 = vpop.f32.mrb[15].mxu1 }
 0x3a0   : > { %v2463_v55 = vpop.f32.mrb[16].mxu1 }
 0x3a1   : > { %v2052_v48 = vpop.f32.mrb[17].mxu1  ;;  %v1154_v5 = vsel %vm533_vm3, %v2463_v55, -inf }
 0x3a2   : > { %v1151_v56 = vpop.f32.mrb[18].mxu1 }
 0x3a3   : > { %v2053_v57 = vpop.f32.mrb[19].mxu1 }
 0x3a8   : > { %v2465_v58 = vpop.f32.mrb[20].mxu1  ;;  %923 = vrot.lane.b32.xlu0 %v2424_v16, %s2239_s22 }
 0x3a9   : > { %v2064_v59 = vpop.f32.mrb[21].mxu1  ;;  %v1264_v6 = vsel %vm533_vm3, %v2465_v58, -inf }
 0x3aa   : > { %v1261_v60 = vpop.f32.mrb[22].mxu1 }
 0x3ab   : > { %v2065_v61 = vpop.f32.mrb[23].mxu1 }
 0x3b0   : > { %v2468_v62 = vpop.f32.mrb[24].mxu1 }
 0x3b1   : > { %v2076_v63 = vpop.f32.mrb[25].mxu1  ;;  %v1374_v7 = vsel %vm533_vm3, %v2468_v62, -inf }
 0x3b2   : > { %v1371_v0 = vpop.f32.mrb[26].mxu1 }
 0x3b3   : > { %v2077_v1 = vpop.f32.mrb[27].mxu1 }
 0x3b7   : > { %1043 = vmax.xlane.f32.xlu1 %v1042_v4 }
 0x3bb   : > { %1155 = vmax.xlane.f32.xlu1 %v1154_v5 }
 0x3c7   : > { %1265 = vmax.xlane.f32.xlu0 %v1264_v6 }
 0x3cc   : > { %1164 = vrot.lane.b32.xlu1 %v992_v45, %s2237_s19 }
 0x3dd   : > { %1274 = vrot.lane.b32.xlu0 %v992_v45, %s2238_s20 }
 0x3f0   : > { %1375 = vmax.xlane.f32.xlu1 %v1374_v7 }
 0x401   : > { %1384 = vrot.lane.b32.xlu1 %v992_v45, %s2239_s22 }
 0x40b   : > { %v582_v10 = vpop.xlane.xlu0 %581 }
 0x40c   : > { %v583_v11 = vsub.f32 %v574_v28, %v582_v10 }
 0x40e   : > { %v584_v12 = vmul.f32 1.442695, %v583_v11 }
 0x40f   : > { %v695_v13 = vpop.xlane.xlu1 %694 }
 0x410   : > { %2178 = vpow2.f32 %v584_v12  ;;  %v696_v14 = vsub.f32 %v687_v33, %v695_v13 }
 0x412   : > { %v697_v15 = vmul.f32 1.442695, %v696_v14 }
 0x414   : > { %2180 = vpow2.f32 %v697_v15 }
 0x417   : > { %v805_v16 = vpop.xlane.xlu0 %804 }
 0x418   : > { %v806_v18 = vsub.f32 %v797_v38, %v805_v16  ;;  %v1054_v38 = vpop.permute.xlu1 %1053 }
 0x419   : > { %v1059_v40 = vsel %vm596_vm4, %v1054_v38, 0 }
 0x41a   : > { %v2480_v19 = vpop.eup %2178  ;;  %v807_v21 = vmul.f32 1.442695, %v806_v18 }
 0x41b   : > { %v589_v23 = vpack.c.bf16 %v2480_v19, %v2480_v19  ;;  %v586_v0 = vsel %vm533_vm3, %v2480_v19, 0.0 }
 0x41c   : > { %2182 = vpow2.f32 %v807_v21 }
 0x41d   : > { %1997 = vmatmul.mubr.msk.bf16.vlgmr.msra.gmra.mrb[8].mxu0 %vm533_vm3, %v589_v23 }
 0x41e   : > { %v2181_v25 = vpop.eup %2180  ;;  %2007 = vmatpush3.bf16.msra.mxu0 %v709_v24  ;;  %2008 = vmatprep.mubr.msk.bf16.mxu0 %vm2227_vm2, %v2226_v17 }
 0x41f   : > { %v915_v26 = vpop.xlane.xlu0 %914  ;;  %v699_v27 = vsel %vm533_vm3, %v2181_v25, 0.0  ;;  %2018 = vmatprep.subr.bf16.mxu0 %v2226_v17  ;;  %v702_v30 = vpack.c.bf16 %v2181_v25, %v2181_v25 }
 0x420   : > { %v916_v28 = vsub.f32 %v2456_v44, %v915_v26  ;;  %700 = vadd.xlane.f32.xlu0 %v699_v27 }
 0x422   : > { %v917_v29 = vmul.f32 1.442695, %v916_v28 }
 0x423   : > { %v924_v34 = vpop.permute.xlu0 %923 }
 0x424   : > { %2184 = vpow2.f32 %v917_v29  ;;  %v929_v36 = vsel %vm596_vm4, %v924_v34, 0 }
 0x425   : > { %2009 = vmatmul.mubr.msk.bf16.vlgmr.msra.gmra.mrb[12].mxu0 %vm533_vm3, %v702_v30 }
 0x426   : > { %v2183_v32 = vpop.eup %2182  ;;  %2019 = vmatpush3.bf16.msra.mxu0 %v819_v31  ;;  %2020 = vmatprep.mubr.msk.bf16.mxu0 %vm2227_vm2, %v2226_v17 }
 0x427   : > { %v809_v33 = vsel %vm533_vm3, %v2183_v32, 0.0  ;;  %2030 = vmatprep.subr.bf16.mxu0 %v2226_v17  ;;  %v812_v35 = vpack.c.bf16 %v2183_v32, %v2183_v32 }
 0x428   : > { %810 = vadd.xlane.f32.xlu0 %v809_v33 }
 0x42d   : > { %2021 = vmatmul.mubr.msk.bf16.vlgmr.msra.gmra.mrb[16].mxu0 %vm533_vm3, %v812_v35 }
 0x42e   : > { %2031 = vmatpush3.bf16.msra.mxu0 %v929_v36  ;;  %2032 = vmatprep.mubr.msk.bf16.mxu0 %vm2227_vm2, %v2226_v17  ;;  %v2185_v37 = vpop.eup %2184 }
 0x42f   : > { %2042 = vmatprep.subr.bf16.mxu0 %v2226_v17  ;;  %v922_v39 = vpack.c.bf16 %v2185_v37, %v2185_v37  ;;  %v919_v63 = vsel %vm533_vm3, %v2185_v37, 0.0 }
 0x435   : > { %2033 = vmatmul.mubr.msk.bf16.vlgmr.msra.gmra.mrb[20].mxu0 %vm533_vm3, %v922_v39 }
 0x436   : > { %2043 = vmatpush3.bf16.msra.mxu0 %v1059_v40  ;;  %2044 = vmatprep.mubr.msk.bf16.mxu0 %vm2227_vm2, %v2226_v17 }
 0x437   : > { %2054 = vmatprep.subr.bf16.mxu0 %v2226_v17 }
 0x444   : > { %v1044_v41 = vpop.xlane.xlu1 %1043 }
 0x445   : > { %v1045_v42 = vsub.f32 %v2461_v51, %v1044_v41 }
 0x447   : > { %v1046_v43 = vmul.f32 1.442695, %v1045_v42 }
 0x448   : > { %v1156_v44 = vpop.xlane.xlu1 %1155 }
 0x449   : > { %2186 = vpow2.f32 %v1046_v43  ;;  %v1157_v45 = vsub.f32 %v2463_v55, %v1156_v44 }
 0x44b   : > { %v1158_v46 = vmul.f32 1.442695, %v1157_v45  ;;  %v2162_v45 = vld [vmem:[%s2312_s15] sm:$0xff]  }
 0x44c   : > { %v1165_v49 = vpop.permute.xlu1 %1164  ;;  %2085 = vmatpush3.bf16.msra.mxu1 %v2162_v45 }
 0x44d   : > { %2188 = vpow2.f32 %v1158_v46  ;;  %v1170_v54 = vsel %vm596_vm4, %v1165_v49, 0  ;;  %2086 = vmatprep.subr.bf16.mxu1 %v2226_v17 }
 0x453   : > { %v2187_v47 = vpop.eup %2186 }
 0x454   : > { %v1266_v50 = vpop.xlane.xlu0 %1265  ;;  %v1051_v52 = vpack.c.bf16 %v2187_v47, %v2187_v47 }
 0x455   : > { %v1267_v53 = vsub.f32 %v2465_v58, %v1266_v50 }
 0x456   : > { %2045 = vmatmul.mubr.msk.bf16.vlgmr.msra.gmra.mrb[24].mxu0 %vm533_vm3, %v1051_v52 }
 0x457   : > { %v2189_v48 = vpop.eup %2188  ;;  %v1268_v56 = vmul.f32 1.442695, %v1267_v53  ;;  %2055 = vmatpush3.bf16.msra.mxu0 %v1170_v54  ;;  %2056 = vmatprep.mubr.msk.bf16.mxu0 %vm2227_vm2, %v2226_v17 }
 0x458   : > { %v1160_v51 = vsel %vm533_vm3, %v2189_v48, 0.0  ;;  %2066 = vmatprep.subr.bf16.mxu0 %v2226_v17  ;;  %v1275_v55 = vpop.permute.xlu0 %1274  ;;  %v1163_v57 = vpack.c.bf16 %v2189_v48, %v2189_v48 }
 0x459   : > { %2190 = vpow2.f32 %v1268_v56  ;;  %1161 = vadd.xlane.f32.xlu1 %v1160_v51  ;;  %v1280_v58 = vsel %vm596_vm4, %v1275_v55, 0 }
 0x45e   : > { %2057 = vmatmul.mubr.msk.bf16.vlgmr.msra.gmra.mrb[28].mxu0 %vm533_vm3, %v1163_v57 }
 0x45f   : > { %2067 = vmatpush3.bf16.msra.mxu0 %v1280_v58  ;;  %2068 = vmatprep.mubr.msk.bf16.mxu0 %vm2227_vm2, %v2226_v17 }
 0x460   : > { %2078 = vmatprep.subr.bf16.mxu0 %v2226_v17 }
 0x463   : > { %v2191_v59 = vpop.eup %2190 }
 0x464   : > { %v1270_v60 = vsel %vm533_vm3, %v2191_v59, 0.0  ;;  %v1273_v61 = vpack.c.bf16 %v2191_v59, %v2191_v59  ;;  %v2163_v59 = vld [vmem:[%s2312_s15 + $0x8] sm:$0xff]  }
 0x465   : > { %1271 = vadd.xlane.f32.xlu0 %v1270_v60  ;;  %2087 = vmatpush3.bf16.msra.mxu1 %v2163_v59  ;;  %v2171_v59 = vld [vmem:[%s2322_s21 + $0x28] sm:$0xff]  }
 0x466   : > { %2069 = vmatmul.mubr.msk.bf16.vlgmr.msra.gmra.mrb[32].mxu0 %vm533_vm3, %v1273_v61  ;;  %2100 = vmatprep.subr.bf16.mxu1 %v2226_v17 }
 0x467   : > { %2080 = vmatprep.mubr.msk.bf16.mxu0 %vm2227_vm2, %v2226_v17 }
 0x469   : > { %920 = vadd.xlane.f32.xlu0 %v919_v63 }
 0x46d   : > { %587 = vadd.xlane.f32.xlu0 %v586_v0 }
 0x47d   : > { %v1376_v1 = vpop.xlane.xlu1 %1375 }
 0x47e   : > { %v1377_v4 = vsub.f32 %v2468_v62, %v1376_v1  ;;  %v1048_v62 = vsel %vm533_vm3, %v2187_v47, 0.0 }
 0x480   : > { %v1378_v5 = vmul.f32 1.442695, %v1377_v4 }
 0x481   : > { %v1385_v6 = vpop.permute.xlu1 %1384 }
 0x482   : > { %2192 = vpow2.f32 %v1378_v5  ;;  %v1390_v7 = vsel %vm596_vm4, %v1385_v6, 0 }
 0x483   : > { %2079 = vmatpush3.bf16.msra.mxu0 %v1390_v7 }
 0x484   : > { %2092 = vmatprep.subr.bf16.mxu0 %v2226_v17 }
 0x48c   : > { %v2193_v8 = vpop.eup %2192 }
 0x48d   : > { %v1380_v9 = vsel %vm533_vm3, %v2193_v8, 0.0  ;;  %v1383_v10 = vpack.c.bf16 %v2193_v8, %v2193_v8 }
 0x48e   : > { %1381 = vadd.xlane.f32.xlu1 %v1380_v9 }
 0x48f   : > { %2081 = vmatmul.mubr.msk.bf16.vlgmr.msra.gmra.mrb[36].mxu0 %vm533_vm3, %v1383_v10 }
 0x490   : > { %2096 = vmatprep.mubr.msk.bf16.mxu0 %vm2227_vm2, %v2226_v17 }
 0x492   : > { %1049 = vadd.xlane.f32.xlu1 %v1048_v62 }
 0x4ad   : > { %v701_v30 = vpop.xlane.xlu0 %700 }
 0x4ae   : > { %2194 = vrcp.f32 %v701_v30 }
 0x4b5   : > { %v811_v32 = vpop.xlane.xlu0 %810 }
 0x4b8   : > { %v2195_v38 = vpop.eup %2194 }
 0x4e6   : > { %v1162_v31 = vpop.xlane.xlu1 %1161 }
 0x4e7   : > { %2196 = vrcp.f32 %v1162_v31 }
 0x4e8   : > { %2198 = vrcp.f32 %v811_v32 }
 0x4f0   : > { %v2536_v11 = vpop.f32.mrb[8].mxu0 }
 0x4f1   : > { %v1998_v12 = vpop.f32.mrb[9].mxu0  ;;  %v2197_v39 = vpop.eup %2196 }
 0x4f2   : > { %v637_v13 = vpop.f32.mrb[10].mxu0  ;;  %v1272_v36 = vpop.xlane.xlu0 %1271 }
 0x4f3   : > { %v1999_v14 = vpop.f32.mrb[11].mxu0  ;;  %2200 = vrcp.f32 %v1272_v36  ;;  %v2199_v49 = vpop.eup %2198 }
 0x4f6   : > { %v921_v57 = vpop.xlane.xlu0 %920 }
 0x4f7   : > { %2202 = vrcp.f32 %v921_v57  ;;  %v2169_v57 = vld [vmem:[%s2322_s21 + $0x18] sm:$0xff]  }
 0x4f8   : > { %v745_v15 = vpop.f32.mrb[12].mxu0 }
 0x4f9   : > { %v2010_v16 = vpop.f32.mrb[13].mxu0  ;;  %v752_v41 = vmul.f32 %v2195_v38, %v745_v15 }
 0x4fa   : > { %v748_v18 = vpop.f32.mrb[14].mxu0  ;;  %v588_v8 = vpop.xlane.xlu0 %587 }
 0x4fb   : > { %v2011_v19 = vpop.f32.mrb[15].mxu0 }
 0x4fd   : > { %v2201_v50 = vpop.eup %2200 }
 0x500   : > { %v855_v21 = vpop.f32.mrb[16].mxu0 }
 0x501   : > { %v2022_v23 = vpop.f32.mrb[17].mxu0  ;;  %v862_v53 = vmul.f32 %v2199_v49, %v855_v21  ;;  %v2203_v60 = vpop.eup %2202 }
 0x502   : > { %v858_v24 = vpop.f32.mrb[18].mxu0 }
 0x503   : > { %v2023_v25 = vpop.f32.mrb[19].mxu0 }
 0x508   : > { %v965_v26 = vpop.f32.mrb[20].mxu0 }
 0x509   : > { %v2034_v27 = vpop.f32.mrb[21].mxu0  ;;  %v972_v0 = vmul.f32 %v2203_v60, %v965_v26 }
 0x50a   : > { %v968_v28 = vpop.f32.mrb[22].mxu0 }
 0x50b   : > { %v2035_v29 = vpop.f32.mrb[23].mxu0 }
 0x51b   : > { %v1382_v58 = vpop.xlane.xlu1 %1381 }
 0x51c   : > { %2204 = vrcp.f32 %v1382_v58  ;;  %v2170_v58 = vld [vmem:[%s2322_s21 + $0x20] sm:$0xff]  }
 0x51d   : > { %2206 = vrcp.f32 %v588_v8 }
 0x51f   : > { %v1050_v9 = vpop.xlane.xlu1 %1049 }
 0x520   : > { %2208 = vrcp.f32 %v1050_v9  ;;  %v1550_v9 = vsub.s32 7, %v2373_v20 }
 0x526   : > { %v2205_v61 = vpop.eup %2204 }
 0x527   : > { %v2207_v62 = vpop.eup %2206 }
 0x528   : > { %v641_v21 = vmul.f32 %v2207_v62, %v2536_v11  ;;  %v1456_v11 = vsub.s32 5, %v2373_v20 }
 0x529   : > { %v1095_v33 = vpop.f32.mrb[24].mxu0 }
 0x52a   : > { %v2046_v34 = vpop.f32.mrb[25].mxu0  ;;  %v2209_v13 = vpop.eup %2208 }
 0x52b   : > { %v1098_v35 = vpop.f32.mrb[26].mxu0  ;;  %v1102_v19 = vmul.f32 %v2209_v13, %v1095_v33  ;;  %v1457_v33 = vrot.slane %v2378_v22, %v1456_v11  ;;  %v1551_v13 = vrot.slane %v2378_v22, %v1550_v9 }
 0x52c   : > { %v2047_v37 = vpop.f32.mrb[27].mxu0 }
 0x531   : > { %v1206_v40 = vpop.f32.mrb[28].mxu0 }
 0x532   : > { %v1213_v42 = vmul.f32 %v2197_v39, %v1206_v40  ;;  %v2058_v43 = vpop.f32.mrb[29].mxu0 }
 0x533   : > { %v1209_v44 = vpop.f32.mrb[30].mxu0 }
 0x534   : > { %v2145_v46 = vpack.i.bf16 %v1213_v42, %v752_v41  ;;  %v2059_v47 = vpop.f32.mrb[31].mxu0 }
 0x536   : > { %2146 = vrot.lane.b32.xlu0 %v2145_v46, %s2240_s23 }
 0x539   : > { %v1316_v52 = vpop.f32.mrb[32].mxu0 }
 0x53a   : > { %v1323_v54 = vmul.f32 %v2201_v50, %v1316_v52  ;;  %v2070_v48 = vpop.f32.mrb[33].mxu0 }
 0x53b   : > { %v1319_v56 = vpop.f32.mrb[34].mxu0  ;;  %v2165_v48 = vld [vmem:[%s2317_s18 + $0x8] sm:$0xff]  }
 0x53c   : > { %v2150_v51 = vpack.i.bf16 %v1323_v54, %v862_v53  ;;  %v2071_v55 = vpop.f32.mrb[35].mxu0  ;;  %v2164_v54 = vld [vmem:[%s2317_s18] sm:$0xff]  }
 0x53d   : > { %2093 = vmatpush3.bf16.msra.mxu0 %v2164_v54  ;;  %v2166_v56 = vld [vmem:[%s2322_s21] sm:$0xff]   ;;  %v2168_v55 = vld [vmem:[%s2322_s21 + $0x10] sm:$0xff]  }
 0x53e   : > { %2151 = vrot.lane.b32.xlu1 %v2150_v51, %s2241_s25  ;;  %2094 = vmatprep.subr.bf16.mxu0 %v2226_v17  ;;  %v2167_v51 = vld [vmem:[%s2322_s21 + $0x8] sm:$0xff]  }
 0x541   : > { %2095 = vmatpush3.bf16.msra.mxu0 %v2165_v48 }
 0x562   : > { %v1426_v63 = vpop.f32.mrb[36].mxu0 }
 0x563   : > { %v1433_v1 = vmul.f32 %v2205_v61, %v1426_v63  ;;  %v2082_v4 = vpop.f32.mrb[37].mxu0 }
 0x564   : > { %v1429_v5 = vpop.f32.mrb[38].mxu0 }
 0x565   : > { %v2155_v6 = vpack.i.bf16 %v1433_v1, %v972_v0  ;;  %v2083_v7 = vpop.f32.mrb[39].mxu0  ;;  %v1544_v5 = vsub.s32 6, %v2373_v20  ;;  %v1907_v20 = vld [vmem:[%s384_s10] ss:$0 sm:$0xff] }
 0x567   : > { %2156 = vrot.lane.b32.xlu1 %v2155_v6, %s2242_s12  ;;  %v1545_v7 = vrot.slane %v2378_v22, %v1544_v5 }
 0x5a8   : > { %v2147_v10 = vpop.permute.xlu0 %2146 }
 0x5a9   : > { %v2149_v14 = vunpack.i.h.bf16 %v2147_v10  ;;  %v2148_v15 = vunpack.i.l.bf16 %v2147_v10 }
 0x5ab   : > { %v1446_v24 = vsel %vm533_vm3, %v1102_v19, %v2149_v14  ;;  %v985_v25 = vsel %vm533_vm3, %v641_v21, %v2148_v15  ;;  %v2172_v19 = vld [vmem:[%s2322_s21 + $0x30] sm:$0xff]   ;;  %v2173_v21 = vld [vmem:[%s2322_s21 + $0x38] sm:$0xff]  }
 0x5b0   : > { %v2152_v12 = vpop.permute.xlu1 %2151 }
 0x5b1   : > { %v2154_v16 = vunpack.i.h.bf16 %v2152_v12  ;;  %v2153_v18 = vunpack.i.l.bf16 %v2152_v12 }
 0x5b3   : > { %v987_v28 = vsel %vm986_vm5, %v985_v25, %v2153_v18  ;;  %v1447_v29 = vsel %vm986_vm5, %v1446_v24, %v2154_v16 }
 0x5d9   : > { %v2157_v23 = vpop.permute.xlu1 %2156 }
 0x5da   : > { %v2159_v26 = vunpack.i.h.bf16 %v2157_v23  ;;  %v2158_v27 = vunpack.i.l.bf16 %v2157_v23 }
 0x5dc   : > { %v989_v30 = vsel %vm988_vm6, %v987_v28, %v2158_v27  ;;  %v1448_v31 = vsel %vm988_vm6, %v1447_v29, %v2159_v26 }
 0x5dd   : > { %v1449_v32 = vpack.c.bf16 %v1448_v31, %v989_v30  ;;  %v1911_v31 = vld [vmem:[%s2327_s24 + $0x8] ss:$0 sm:$0xff] }
 0x5df   : > { %2089 = vmatmul.mubr.msk.bf16.vlgmr.msra.gmra.mrb[28].mxu1 %vm400_vm1, %v1449_v32 }
 0x5e0   : > { %2116 = vmatprep.mubr.msk.bf16.mxu1 %vm2227_vm2, %v2226_v17  ;;  %2101 = vmatpush3.bf16.msra.mxu1 %v2166_v56 }
 0x5e1   : > { %2102 = vmatprep.subr.bf16.mxu1 %v2226_v17 }
 0x5e4   : > { %2103 = vmatpush3.bf16.msra.mxu1 %v2167_v51 }
 0x5e5   : > { %2104 = vmatprep.subr.bf16.mxu1 %v2226_v17 }
 0x5e8   : > { %2105 = vmatpush3.bf16.msra.mxu1 %v2168_v55 }
 0x5e9   : > { %2106 = vmatprep.subr.bf16.mxu1 %v2226_v17 }
 0x5ec   : > { %2107 = vmatpush3.bf16.msra.mxu1 %v2169_v57  ;;  %v1921_v57 = vld [vmem:[%s2638_s7] ss:$0 sm:$0xff] (!%p1920_p5) }
 0x5ed   : > { %2108 = vmatprep.subr.bf16.mxu1 %v2226_v17 }
 0x5f0   : > { %2109 = vmatpush3.bf16.msra.mxu1 %v2170_v58 }
 0x5f1   : > { %2110 = vmatprep.subr.bf16.mxu1 %v2226_v17 }
 0x5f4   : > { %2111 = vmatpush3.bf16.msra.mxu1 %v2171_v59  ;;  %v1922_v59 = vld [vmem:[%s2638_s7 + $0x1] ss:$0 sm:$0xff] (!%p1920_p5) }
 0x5f5   : > { %2112 = vmatprep.subr.bf16.mxu1 %v2226_v17 }
 0x5f8   : > { %2113 = vmatpush3.bf16.msra.mxu1 %v2172_v19 }
 0x5f9   : > { %2114 = vmatprep.subr.bf16.mxu1 %v2226_v17 }
 0x5fc   : > { %2115 = vmatpush3.bf16.msra.mxu1 %v2173_v21 }
 0x6b2   : > { %v1507_v34 = vpop.f32.mrb[28].mxu1 }
 0x6b3   : > { %v1508_v35 = vadd.f32 %v1507_v34, %v1457_v33  ;;  %v2090_v36 = vpop.f32.mrb[29].mxu1 }
 0x6b4   : > { %v1510_v37 = vpop.f32.mrb[30].mxu1 }
 0x6b5   : > { %v2551_v38 = vadd.f32 %v1508_v35, %v2349_v2  ;;  %v1511_v39 = vadd.f32 %v1510_v37, %v1457_v33  ;;  %v2091_v40 = vpop.f32.mrb[31].mxu1 }
 0x6b7   : > { %v2554_v41 = vadd.f32 %v1511_v39, %v2354_v3  ;;  %v1516_v42 = vsel %vm400_vm1, %v2551_v38, 0.0 }
 0x6b8   : > { %1517 = vadd.xlane.f32.xlu1 %v1516_v42 }
 0x6b9   : > { %v1519_v43 = vsel %vm400_vm1, %v2554_v41, 0.0 }
 0x6ba   : > { %1520 = vadd.xlane.f32.xlu0 %v1519_v43 }
 0x745   : > { %v1518_v44 = vpop.xlane.xlu1 %1517 }
 0x746   : > { %v1522_v45 = vmul.f32 0.03125, %v1518_v44 }
 0x747   : > { %v1521_v2 = vpop.xlane.xlu0 %1520 }
 0x748   : > { %v1524_v46 = vsub.f32 %v2551_v38, %v1522_v45  ;;  %v1523_v47 = vmul.f32 0.03125, %v1521_v2 }
 0x74a   : > { %v1525_v3 = vsub.f32 %v2554_v41, %v1523_v47  ;;  %v1526_v49 = vmul.f32 %v1524_v46, %v1524_v46 }
 0x74c   : > { %v1528_v50 = vsel %vm400_vm1, %v1526_v49, 0.0  ;;  %v1527_v52 = vmul.f32 %v1525_v3, %v1525_v3 }
 0x74d   : > { %1529 = vadd.xlane.f32.xlu0 %v1528_v50 }
 0x74e   : > { %v1531_v53 = vsel %vm400_vm1, %v1527_v52, 0.0 }
 0x751   : > { %1532 = vadd.xlane.f32.xlu0 %v1531_v53 }
 0x7da   : > { %v1530_v60 = vpop.xlane.xlu0 %1529 }
 0x7db   : > { %v1534_v61 = vmul.f32 0.03125, %v1530_v60 }
 0x7dd   : > { %v1536_v63 = vadd.f32 1e-05, %v1534_v61 }
 0x7de   : > { %v1533_v0 = vpop.xlane.xlu0 %1532 }
 0x7df   : > { %2210 = vrsqrt.f32 %v1536_v63  ;;  %v1535_v1 = vmul.f32 0.03125, %v1533_v0 }
 0x7e1   : > { %v1537_v4 = vadd.f32 1e-05, %v1535_v1 }
 0x7e3   : > { %2212 = vrsqrt.f32 %v1537_v4 }
 0x7e9   : > { %v2211_v6 = vpop.eup %2210 }
 0x7ea   : > { %v1540_v8 = vmul.f32 %v2211_v6, %v1524_v46 }
 0x7ec   : > { %v1546_v62 = vmul.f32 %v1545_v7, %v1540_v8 }
 0x7ed   : > { %v2213_v10 = vpop.eup %2212 }
 0x7ee   : > { %v1541_v12 = vmul.f32 %v2213_v10, %v1525_v3  ;;  %v1552_v15 = vadd.f32 %v1551_v13, %v1546_v62 }
 0x7f0   : > { %v1547_v14 = vmul.f32 %v1545_v7, %v1541_v12 }
 0x7f2   : > { %v1553_v16 = vadd.f32 %v1551_v13, %v1547_v14 }
 0x7f4   : > { %v1554_v18 = vpack.c.bf16 %v1553_v16, %v1552_v15 }
 0x7f6   : > { %2097 = vmatmul.mubr.msk.bf16.vlgmr.msra.gmra.mrb[40].mxu0 %vm400_vm1, %v1554_v18 }
 0x8c9   : > { %v1614_v23 = vpop.f32.mrb[40].mxu0 }
 0x8ca   : > { %v1615_v22 = vadd.f32 %v1907_v20, %v1614_v23  ;;  %v2098_v24 = vpop.f32.mrb[41].mxu0 }
 0x8cb   : > { %v1617_v25 = vpop.f32.mrb[42].mxu0 }
 0x8cc   : > { %v1618_v26 = vadd.f32 %v1907_v20, %v1617_v25  ;;  %v2099_v27 = vpop.f32.mrb[43].mxu0  ;;  %v1621_v28 = vmax.f32 %v1615_v22, 0.0 }
 0x8ce   : > { %v1622_v29 = vmax.f32 %v1618_v26, 0.0 }
 0x8d0   : > { %v1623_v30 = vpack.c.bf16 %v1622_v29, %v1621_v28 }
 0x8d2   : > { %2117 = vmatmul.mubr.bf16.vlgmr.msra.gmra.mrb[32].mxu1 %v1623_v30 }
 0x9a5   : > { %v1726_v32 = vpop.f32.mrb[32].mxu1 }
 0x9a6   : > { %v1727_v17 = vadd.f32 %v1911_v31, %v1726_v32  ;;  %v2118_v11 = vpop.f32.mrb[33].mxu1  ;;  %1740 = sbr.rel (%p1920_p5) target bundleno = 2800 (0xaf0), region = 60 }
 0x9a7   : > { %v1729_v33 = vpop.f32.mrb[34].mxu1 }
 0x9a8   : > { %v1733_v34 = vadd.f32 %v1727_v17, %v2551_v38  ;;  %v1730_v35 = vadd.f32 %v1911_v31, %v1729_v33  ;;  %v2119_v36 = vpop.f32.mrb[35].mxu1 }
 0x9aa   : > { %1735 = vst.msk [vmem:[%s2639_s8] sm:$0xff] %vm400_vm1, %v1733_v34  ;;  %v1734_v37 = vadd.f32 %v1730_v35, %v2554_v41 }
 0x9ac   : > { %1736 = vst.msk [vmem:[%s2639_s8 + $0x8] sm:$0xff] %vm400_vm1, %v1734_v37 }
 0x9b1   : > { %v1741_v38 = vld [vmem:[%s2639_s8] sm:$0xff] }
 0x9b2   : > { %v1745_v40 = vsel %vm400_vm1, %v1741_v38, 0.0 }
 0x9b3   : > { %v1742_v39 = vld [vmem:[%s2639_s8 + $0x8] sm:$0xff]  ;;  %1746 = vadd.xlane.f32.xlu0 %v1745_v40 }
 0x9b4   : > { %v1748_v41 = vsel %vm400_vm1, %v1742_v39, 0.0 }
 0x9b7   : > { %1749 = vadd.xlane.f32.xlu0 %v1748_v41 }
 0xa40   : > { %v1747_v42 = vpop.xlane.xlu0 %1746 }
 0xa41   : > { %v1751_v43 = vmul.f32 0.03125, %v1747_v42 }
 0xa43   : > { %v1753_v44 = vsub.f32 %v1741_v38, %v1751_v43 }
 0xa44   : > { %v1750_v45 = vpop.xlane.xlu0 %1749 }
 0xa45   : > { %v1752_v2 = vmul.f32 0.03125, %v1750_v45  ;;  %v1755_v46 = vmul.f32 %v1753_v44, %v1753_v44 }
 0xa47   : > { %v1754_v47 = vsub.f32 %v1742_v39, %v1752_v2  ;;  %v1757_v3 = vsel %vm400_vm1, %v1755_v46, 0.0 }
 0xa48   : > { %1758 = vadd.xlane.f32.xlu1 %v1757_v3 }
 0xa49   : > { %v1756_v49 = vmul.f32 %v1754_v47, %v1754_v47 }
 0xa4b   : > { %v1760_v50 = vsel %vm400_vm1, %v1756_v49, 0.0 }
 0xa4c   : > { %1761 = vadd.xlane.f32.xlu1 %v1760_v50 }
 0xad5   : > { %v1759_v52 = vpop.xlane.xlu1 %1758 }
 0xad6   : > { %v1763_v53 = vmul.f32 0.03125, %v1759_v52 }
 0xad8   : > { %v1765_v54 = vadd.f32 1e-05, %v1763_v53 }
 0xad9   : > { %v1762_v48 = vpop.xlane.xlu1 %1761 }
 0xada   : > { %2214 = vrsqrt.f32 %v1765_v54  ;;  %v1764_v56 = vmul.f32 0.03125, %v1762_v48 }
 0xadc   : > { %v1766_v51 = vadd.f32 1e-05, %v1764_v56 }
 0xade   : > { %2216 = vrsqrt.f32 %v1766_v51 }
 0xae4   : > { %v2215_v55 = vpop.eup %2214 }
 0xae5   : > { %v1769_v58 = vmul.f32 %v2215_v55, %v1753_v44 }
 0xae7   : > { %v1775_v60 = vmul.f32 %v1921_v57, %v1769_v58 }
 0xae8   : > { %v2217_v61 = vpop.eup %2216 }
 0xae9   : > { %v1781_v63 = vadd.f32 %v1922_v59, %v1775_v60  ;;  %v1770_v0 = vmul.f32 %v2217_v61, %v1754_v47 }
 0xaeb   : > { %1783 = vst.msk [vmem:[%s2639_s8] sm:$0xff] %vm400_vm1, %v1781_v63  ;;  %v1776_v1 = vmul.f32 %v1921_v57, %v1770_v0 }
 0xaed   : > { %v1782_v4 = vadd.f32 %v1922_v59, %v1776_v1 }
 0xaef   : > { %1784 = vst.msk [vmem:[%s2639_s8 + $0x8] sm:$0xff] %vm400_vm1, %v1782_v4 }
 0xaf0 PF: > { %s18_s27 = sadd.s32 1, %s2224_s27  }
 0xaf1   : > { %p15_p6 = scmp.ge.s32.totalorder %s18_s27, 4  }
 0xaf3   :  { %17 = sbr.rel (!%p15_p6) target bundleno = 1 (0x1), region = 101 }

</bundles_post_ra>
